<compile_context>
chip_gen: v7x
topology: tpu7x:2x2x1
jax: 0.10.0
libtpu: 0.0.40
codegen_flags: <defaults>
</compile_context>

<pallas_src>
import jax
import jax.numpy as jnp
from jax.experimental import pallas as pl
from jax.experimental.pallas import tpu as pltpu


HIDDEN_DIMS = (128, 64, 32, 16, 1)


def _round_up(x, m):
    return ((x + m - 1) // m) * m


def _dense_relu(h, w_ref, b_ref, out_dtype):
    """One Linear + ReLU layer: MXU matmul with f32 accumulation."""
    acc = jnp.dot(h, w_ref[...], preferred_element_type=jnp.float32)
    return jnp.maximum(acc + b_ref[...], 0.0).astype(out_dtype)


def _mlp_kernel(x_ref,
                w1_ref, b1_ref,
                w2_ref, b2_ref,
                w3_ref, b3_ref,
                w4_ref, b4_ref,
                w5_ref, b5_ref,
                o_ref):
    """Fused 5-layer MLP forward for one batch tile, all operands in VMEM."""
    cdt = w1_ref.dtype  # compute dtype for MXU operands (bf16 or f32)

    # x arrives as f32 blocks; cast on the VPU here (free under MXU slack).
    h = x_ref[...].astype(cdt)                       # (T, input_dim)
    h = _dense_relu(h, w1_ref, b1_ref, cdt)          # (T, 128)
    h = _dense_relu(h, w2_ref, b2_ref, cdt)          # (T, 64)
    h = _dense_relu(h, w3_ref, b3_ref, cdt)          # (T, 32)
    h = _dense_relu(h, w4_ref, b4_ref, jnp.float32)  # (T, 16), f32 for the head

    # Final 16 -> 1 regression head on the VPU/XLU (no N=1 MXU push):
    # out[t] = sum_k h[t, k] * w5[0, k] + b5
    col = jnp.sum(h * w5_ref[...], axis=-1, keepdims=True)   # (T, 1) f32
    col = col + b5_ref[...]

    # Lane-dense store: transpose the (T, 1) column to a (1, T) row so the
    # output block is unmasked along the lane axis.
    row = jnp.transpose(col)                                  # (1, T)
    o_ref[...] = row.reshape(o_ref.shape).astype(o_ref.dtype)


def prepare_params(raw_params, *, use_bf16=True):
    """One-time param prep: cast MXU weights to bf16, reshape the head."""
    cdt = jnp.bfloat16 if use_bf16 else jnp.float32
    return {
        "w1": jnp.asarray(raw_params["w1"], cdt),
        "w2": jnp.asarray(raw_params["w2"], cdt),
        "w3": jnp.asarray(raw_params["w3"], cdt),
        "w4": jnp.asarray(raw_params["w4"], cdt),
        "b1": jnp.asarray(raw_params["b1"], jnp.float32),
        "b2": jnp.asarray(raw_params["b2"], jnp.float32),
        "b3": jnp.asarray(raw_params["b3"], jnp.float32),
        "b4": jnp.asarray(raw_params["b4"], jnp.float32),
        "w5": jnp.asarray(raw_params["w5"], jnp.float32).reshape(1, -1),  # (1, 16)
        "b5": jnp.asarray(raw_params["b5"], jnp.float32).reshape(1, 1),   # (1, 1)
    }


def deep_frp_net_forward(x, params, *, batch_tile=None):
    """Run the fused MLP kernel.

    x:      (B, input_dim) float32
    params: output of prepare_params() (bf16 MXU weights, f32 biases / head).
    """
    B, input_dim = x.shape

    if batch_tile is None:
        # ~2048-row tiles amortize per-step overhead / MXU fill-drain, keep
        # >= 2 grid steps when B permits (v7x megacore), multiple of 256.
        batch_tile = min(2048, max(256, _round_up((B + 1) // 2, 256)))

    num_tiles = (B + batch_tile - 1) // batch_tile
    b_pad = num_tiles * batch_tile
    if b_pad != B:
        # Zero-pad; padded rows produce bias-driven outputs that are sliced
        # off below and never reused.
        x = jnp.pad(x, ((0, b_pad - B), (0, 0)))

    w1, b1 = params["w1"], params["b1"]
    w2, b2 = params["w2"], params["b2"]
    w3, b3 = params["w3"], params["b3"]
    w4, b4 = params["w4"], params["b4"]
    w5, b5 = params["w5"], params["b5"]

    # Weights/biases are tiny: full-array blocks with a constant index_map so
    # they stay resident in VMEM across grid steps.
    def resident(arr):
        return pl.BlockSpec(arr.shape, lambda i: (0, 0))

    flops_per_row = 2 * (input_dim * 128 + 128 * 64 + 64 * 32 + 32 * 16 + 16 * 1)
    param_bytes = sum(int(v.size) * jnp.dtype(v.dtype).itemsize
                      for v in params.values())
    cost = pl.CostEstimate(
        flops=flops_per_row * b_pad,
        transcendentals=0,
        bytes_accessed=int(b_pad * input_dim * 4 + b_pad * 4 + param_bytes),
    )

    out = pl.pallas_call(
        _mlp_kernel,
        # Lane-dense output: one (1, 1, batch_tile) row block per grid step.
        out_shape=jax.ShapeDtypeStruct((num_tiles, 1, batch_tile), jnp.float32),
        grid_spec=pltpu.PrefetchScalarGridSpec(
            num_scalar_prefetch=0,
            grid=(num_tiles,),
            in_specs=[
                pl.BlockSpec((batch_tile, input_dim), lambda i: (i, 0)),  # x
                resident(w1), resident(b1),
                resident(w2), resident(b2),
                resident(w3), resident(b3),
                resident(w4), resident(b4),
                resident(w5), resident(b5),
            ],
            out_specs=pl.BlockSpec((1, 1, batch_tile), lambda i: (i, 0, 0)),
        ),
        compiler_params=pltpu.CompilerParams(
            dimension_semantics=("parallel",)),
        cost_estimate=cost,
    )(x, w1, b1, w2, b2, w3, b3, w4, b4, w5, b5)

    # (num_tiles, 1, batch_tile) -> (b_pad, 1), drop padded rows.
    return out.reshape(b_pad, 1)[:B]


def init_params(key, input_dim):
    """Deterministic init mirroring nn.Linear default (U[-1/sqrt(fan_in), +])."""
    dims = [input_dim, 128, 64, 32, 16, 1]
    params = {}
    for idx in range(5):
        fan_in, fan_out = dims[idx], dims[idx + 1]
        key, kw, kb = jax.random.split(key, 3)
        bound = 1.0 / jnp.sqrt(fan_in)
        # stored as (in, out) = transpose of PyTorch's (out, in)
        params[f"w{idx + 1}"] = jax.random.uniform(
            kw, (fan_in, fan_out), jnp.float32, -bound, bound)
        params[f"b{idx + 1}"] = jax.random.uniform(
            kb, (1, fan_out), jnp.float32, -bound, bound)
    return params


def reference_forward(x, raw_params):
    """Pure-JAX f32 reference for correctness check."""
    h = x
    for idx in range(1, 5):
        h = jnp.maximum(h @ raw_params[f"w{idx}"] + raw_params[f"b{idx}"], 0.0)
    return h @ raw_params["w5"] + raw_params["b5"]


def _rel_err(a, b):
    return float(jnp.max(jnp.abs(a - b)) / (jnp.max(jnp.abs(b)) + 1e-6))


if __name__ == "__main__":
    key = jax.random.PRNGKey(0)
    input_dim = 32  # numeric + one-hot categorical features

    key, kx = jax.random.split(key)
    raw_params = init_params(key, input_dim)
    params = prepare_params(raw_params, use_bf16=True)

    # Two grid steps (adaptive tile -> 256, num_tiles=2): tiled/megacore path.
    x = jax.random.normal(kx, (512, input_dim), jnp.float32)
    out = jax.block_until_ready(deep_frp_net_forward(x, params))
    ref = reference_forward(x, raw_params)
    assert out.shape == (512, 1)
    assert _rel_err(out, ref) < 5e-2, "mismatch vs reference (tiled path)"

    # Ragged batch: exercises the zero-padding remainder path (single tile).
    x2 = jax.random.normal(jax.random.PRNGKey(1), (100, input_dim), jnp.float32)
    out2 = jax.block_until_ready(deep_frp_net_forward(x2, params))
    ref2 = reference_forward(x2, raw_params)
    assert out2.shape == (100, 1)
    assert _rel_err(out2, ref2) < 5e-2, "mismatch vs reference (ragged path)"

    # Larger batch: exercises the bigger (1536-row) tiles, still 2 grid steps.
    x3 = jax.random.normal(jax.random.PRNGKey(2), (3000, input_dim), jnp.float32)
    out3 = jax.block_until_ready(deep_frp_net_forward(x3, params))
    ref3 = reference_forward(x3, raw_params)
    assert out3.shape == (3000, 1)
    assert _rel_err(out3, ref3) < 5e-2, "mismatch vs reference (large-tile path)"

    print("KERNEL_OK")
</pallas_src>

<mosaic_0001>
module attributes {stable_mosaic.version = 11 : i64} {
  func.func @_mlp_kernel(%arg0: i32, %arg1: memref<256x32xf32, #tpu.memory_space<vmem>>, %arg2: memref<32x128xbf16, #tpu.memory_space<vmem>>, %arg3: memref<1x128xf32, #tpu.memory_space<vmem>>, %arg4: memref<128x64xbf16, #tpu.memory_space<vmem>>, %arg5: memref<1x64xf32, #tpu.memory_space<vmem>>, %arg6: memref<64x32xbf16, #tpu.memory_space<vmem>>, %arg7: memref<1x32xf32, #tpu.memory_space<vmem>>, %arg8: memref<32x16xbf16, #tpu.memory_space<vmem>>, %arg9: memref<1x16xf32, #tpu.memory_space<vmem>>, %arg10: memref<1x16xf32, #tpu.memory_space<vmem>>, %arg11: memref<1x1xf32, #tpu.memory_space<vmem>>, %arg12: memref<1x1x256xf32, #tpu.memory_space<vmem>>) attributes {dimension_semantics = [#tpu.dimension_semantics<parallel>], iteration_bounds = array<i64: 2>, scalar_prefetch = 0 : i64, scratch_operands = 0 : i64, tpu.core_type = #tpu.core_type<tc>, window_params = [{transform_indices = @transform_0, window_bounds = array<i64: 256, 32>}, {pipeline_mode = #tpu.pipeline_mode<synchronous>, transform_indices = @transform_1, window_bounds = array<i64: 32, 128>}, {pipeline_mode = #tpu.pipeline_mode<synchronous>, transform_indices = @transform_2, window_bounds = array<i64: 1, 128>}, {pipeline_mode = #tpu.pipeline_mode<synchronous>, transform_indices = @transform_3, window_bounds = array<i64: 128, 64>}, {pipeline_mode = #tpu.pipeline_mode<synchronous>, transform_indices = @transform_4, window_bounds = array<i64: 1, 64>}, {pipeline_mode = #tpu.pipeline_mode<synchronous>, transform_indices = @transform_5, window_bounds = array<i64: 64, 32>}, {pipeline_mode = #tpu.pipeline_mode<synchronous>, transform_indices = @transform_6, window_bounds = array<i64: 1, 32>}, {pipeline_mode = #tpu.pipeline_mode<synchronous>, transform_indices = @transform_7, window_bounds = array<i64: 32, 16>}, {pipeline_mode = #tpu.pipeline_mode<synchronous>, transform_indices = @transform_8, window_bounds = array<i64: 1, 16>}, {pipeline_mode = #tpu.pipeline_mode<synchronous>, transform_indices = @transform_9, window_bounds = array<i64: 1, 16>}, {pipeline_mode = #tpu.pipeline_mode<synchronous>, transform_indices = @transform_10, window_bounds = array<i64: 1, 1>}, {transform_indices = @transform_11, window_bounds = array<i64: 1, 1, 256>}]} {
    %c0 = arith.constant 0 : index
    %c0_0 = arith.constant 0 : index
    %0 = vector.load %arg1[%c0, %c0_0] : memref<256x32xf32, #tpu.memory_space<vmem>>, vector<256x32xf32>
    %1 = arith.truncf %0 : vector<256x32xf32> to vector<256x32xbf16>
    %c0_1 = arith.constant 0 : index
    %c0_2 = arith.constant 0 : index
    %2 = vector.load %arg2[%c0_1, %c0_2] : memref<32x128xbf16, #tpu.memory_space<vmem>>, vector<32x128xbf16>
    %cst = arith.constant dense<0.000000e+00> : vector<256x128xf32>
    %3 = tpu.matmul %1, %2, %cst {dimension_numbers = #tpu.dot_dimension_numbers<[1], [0], [0], [1], [0, 0, 1, 1], [], []>} : vector<256x32xbf16>, vector<32x128xbf16>, vector<256x128xf32> -> vector<256x128xf32>
    %c0_3 = arith.constant 0 : index
    %c0_4 = arith.constant 0 : index
    %4 = vector.load %arg3[%c0_3, %c0_4] : memref<1x128xf32, #tpu.memory_space<vmem>>, vector<1x128xf32>
    %5 = vector.broadcast %4 : vector<1x128xf32> to vector<256x128xf32>
    %6 = arith.addf %3, %5 : vector<256x128xf32>
    %cst_5 = arith.constant 0.000000e+00 : f32
    %7 = vector.broadcast %cst_5 : f32 to vector<256x128xf32>
    %8 = arith.maximumf %6, %7 : vector<256x128xf32>
    %9 = arith.truncf %8 : vector<256x128xf32> to vector<256x128xbf16>
    %c0_6 = arith.constant 0 : index
    %c0_7 = arith.constant 0 : index
    %10 = vector.load %arg4[%c0_6, %c0_7] : memref<128x64xbf16, #tpu.memory_space<vmem>>, vector<128x64xbf16>
    %cst_8 = arith.constant dense<0.000000e+00> : vector<256x64xf32>
    %11 = tpu.matmul %9, %10, %cst_8 {dimension_numbers = #tpu.dot_dimension_numbers<[1], [0], [0], [1], [0, 0, 1, 1], [], []>} : vector<256x128xbf16>, vector<128x64xbf16>, vector<256x64xf32> -> vector<256x64xf32>
    %c0_9 = arith.constant 0 : index
    %c0_10 = arith.constant 0 : index
    %12 = vector.load %arg5[%c0_9, %c0_10] : memref<1x64xf32, #tpu.memory_space<vmem>>, vector<1x64xf32>
    %13 = vector.broadcast %12 : vector<1x64xf32> to vector<256x64xf32>
    %14 = arith.addf %11, %13 : vector<256x64xf32>
    %cst_11 = arith.constant 0.000000e+00 : f32
    %15 = vector.broadcast %cst_11 : f32 to vector<256x64xf32>
    %16 = arith.maximumf %14, %15 : vector<256x64xf32>
    %17 = arith.truncf %16 : vector<256x64xf32> to vector<256x64xbf16>
    %c0_12 = arith.constant 0 : index
    %c0_13 = arith.constant 0 : index
    %18 = vector.load %arg6[%c0_12, %c0_13] : memref<64x32xbf16, #tpu.memory_space<vmem>>, vector<64x32xbf16>
    %cst_14 = arith.constant dense<0.000000e+00> : vector<256x32xf32>
    %19 = tpu.matmul %17, %18, %cst_14 {dimension_numbers = #tpu.dot_dimension_numbers<[1], [0], [0], [1], [0, 0, 1, 1], [], []>} : vector<256x64xbf16>, vector<64x32xbf16>, vector<256x32xf32> -> vector<256x32xf32>
    %c0_15 = arith.constant 0 : index
    %c0_16 = arith.constant 0 : index
    %20 = vector.load %arg7[%c0_15, %c0_16] : memref<1x32xf32, #tpu.memory_space<vmem>>, vector<1x32xf32>
    %21 = vector.broadcast %20 : vector<1x32xf32> to vector<256x32xf32>
    %22 = arith.addf %19, %21 : vector<256x32xf32>
    %cst_17 = arith.constant 0.000000e+00 : f32
    %23 = vector.broadcast %cst_17 : f32 to vector<256x32xf32>
    %24 = arith.maximumf %22, %23 : vector<256x32xf32>
    %25 = arith.truncf %24 : vector<256x32xf32> to vector<256x32xbf16>
    %c0_18 = arith.constant 0 : index
    %c0_19 = arith.constant 0 : index
    %26 = vector.load %arg8[%c0_18, %c0_19] : memref<32x16xbf16, #tpu.memory_space<vmem>>, vector<32x16xbf16>
    %cst_20 = arith.constant dense<0.000000e+00> : vector<256x16xf32>
    %27 = tpu.matmul %25, %26, %cst_20 {dimension_numbers = #tpu.dot_dimension_numbers<[1], [0], [0], [1], [0, 0, 1, 1], [], []>} : vector<256x32xbf16>, vector<32x16xbf16>, vector<256x16xf32> -> vector<256x16xf32>
    %c0_21 = arith.constant 0 : index
    %c0_22 = arith.constant 0 : index
    %28 = vector.load %arg9[%c0_21, %c0_22] : memref<1x16xf32, #tpu.memory_space<vmem>>, vector<1x16xf32>
    %29 = vector.broadcast %28 : vector<1x16xf32> to vector<256x16xf32>
    %30 = arith.addf %27, %29 : vector<256x16xf32>
    %cst_23 = arith.constant 0.000000e+00 : f32
    %31 = vector.broadcast %cst_23 : f32 to vector<256x16xf32>
    %32 = arith.maximumf %30, %31 : vector<256x16xf32>
    %c0_24 = arith.constant 0 : index
    %c0_25 = arith.constant 0 : index
    %33 = vector.load %arg10[%c0_24, %c0_25] : memref<1x16xf32, #tpu.memory_space<vmem>>, vector<1x16xf32>
    %34 = vector.broadcast %33 : vector<1x16xf32> to vector<256x16xf32>
    %35 = arith.mulf %32, %34 : vector<256x16xf32>
    %cst_26 = arith.constant dense<0.000000e+00> : vector<256xf32>
    %36 = vector.multi_reduction <add>, %35, %cst_26 [1] : vector<256x16xf32> to vector<256xf32>
    %37 = vector.shape_cast %36 : vector<256xf32> to vector<256x1xf32>
    %c0_27 = arith.constant 0 : index
    %c0_28 = arith.constant 0 : index
    %38 = vector.load %arg11[%c0_27, %c0_28] : memref<1x1xf32, #tpu.memory_space<vmem>>, vector<1x1xf32>
    %39 = vector.broadcast %38 : vector<1x1xf32> to vector<256x1xf32>
    %40 = arith.addf %37, %39 : vector<256x1xf32>
    %41 = tpu.transpose %40, [1, 0] : vector<256x1xf32> -> vector<1x256xf32>
    %42 = vector.shape_cast %41 : vector<1x256xf32> to vector<1x1x256xf32>
    %c0_29 = arith.constant 0 : index
    %c0_30 = arith.constant 0 : index
    %c0_31 = arith.constant 0 : index
    %43 = vector.load %arg12[%c0_29, %c0_30, %c0_31] : memref<1x1x256xf32, #tpu.memory_space<vmem>>, vector<1x1x256xf32>
    tpu.vector_store %arg12[%c0_29, %c0_30, %c0_31], %42 {strides = array<i32>} : memref<1x1x256xf32, #tpu.memory_space<vmem>>, vector<1x1x256xf32>,
    return
  }
  func.func @transform_0(%arg0: i32) -> (i32, i32) {
    %c0_i32 = arith.constant 0 : i32
    %c0_i32_0 = arith.constant 0 : i32
    return %arg0, %c0_i32 : i32, i32
  }
  func.func @transform_1(%arg0: i32) -> (i32, i32) {
    %c0_i32 = arith.constant 0 : i32
    %c0_i32_0 = arith.constant 0 : i32
    %c0_i32_1 = arith.constant 0 : i32
    return %c0_i32, %c0_i32_0 : i32, i32
  }
  func.func @transform_2(%arg0: i32) -> (i32, i32) {
    %c0_i32 = arith.constant 0 : i32
    %c0_i32_0 = arith.constant 0 : i32
    %c0_i32_1 = arith.constant 0 : i32
    return %c0_i32, %c0_i32_0 : i32, i32
  }
  func.func @transform_3(%arg0: i32) -> (i32, i32) {
    %c0_i32 = arith.constant 0 : i32
    %c0_i32_0 = arith.constant 0 : i32
    %c0_i32_1 = arith.constant 0 : i32
    return %c0_i32, %c0_i32_0 : i32, i32
  }
  func.func @transform_4(%arg0: i32) -> (i32, i32) {
    %c0_i32 = arith.constant 0 : i32
    %c0_i32_0 = arith.constant 0 : i32
    %c0_i32_1 = arith.constant 0 : i32
    return %c0_i32, %c0_i32_0 : i32, i32
  }
  func.func @transform_5(%arg0: i32) -> (i32, i32) {
    %c0_i32 = arith.constant 0 : i32
    %c0_i32_0 = arith.constant 0 : i32
    %c0_i32_1 = arith.constant 0 : i32
    return %c0_i32, %c0_i32_0 : i32, i32
  }
  func.func @transform_6(%arg0: i32) -> (i32, i32) {
    %c0_i32 = arith.constant 0 : i32
    %c0_i32_0 = arith.constant 0 : i32
    %c0_i32_1 = arith.constant 0 : i32
    return %c0_i32, %c0_i32_0 : i32, i32
  }
  func.func @transform_7(%arg0: i32) -> (i32, i32) {
    %c0_i32 = arith.constant 0 : i32
    %c0_i32_0 = arith.constant 0 : i32
    %c0_i32_1 = arith.constant 0 : i32
    return %c0_i32, %c0_i32_0 : i32, i32
  }
  func.func @transform_8(%arg0: i32) -> (i32, i32) {
    %c0_i32 = arith.constant 0 : i32
    %c0_i32_0 = arith.constant 0 : i32
    %c0_i32_1 = arith.constant 0 : i32
    return %c0_i32, %c0_i32_0 : i32, i32
  }
  func.func @transform_9(%arg0: i32) -> (i32, i32) {
    %c0_i32 = arith.constant 0 : i32
    %c0_i32_0 = arith.constant 0 : i32
    %c0_i32_1 = arith.constant 0 : i32
    return %c0_i32, %c0_i32_0 : i32, i32
  }
  func.func @transform_10(%arg0: i32) -> (i32, i32) {
    %c0_i32 = arith.constant 0 : i32
    %c0_i32_0 = arith.constant 0 : i32
    %c0_i32_1 = arith.constant 0 : i32
    return %c0_i32, %c0_i32_0 : i32, i32
  }
  func.func @transform_11(%arg0: i32) -> (i32, i32, i32) {
    %c0_i32 = arith.constant 0 : i32
    %c0_i32_0 = arith.constant 0 : i32
    %c0_i32_1 = arith.constant 0 : i32
    return %arg0, %c0_i32, %c0_i32_0 : i32, i32, i32
  }
}

</mosaic_0001>

<bundles_post_ra>
// kernel: tpu_custom_call.1
= control target key start
LH: loop header
LB: loop body
LE: loop exit
PB: predicated region body
PF: predicated region fallthrough
CT: control target
= control target key end

     0   :  { %s2891_s0 = inlined_call_operand.vmem [shape: f32[512,32], index: 0, kind: input, shape index: {}]   ;;  %s2892_s1 = inlined_call_operand.vmem [shape: bf16[32,128], index: 1, kind: input, shape index: {}]   ;;  %s2893_s2 = inlined_call_operand.vmem [shape: f32[1,128], index: 2, kind: input, shape index: {}]   ;;  %s2894_s3 = inlined_call_operand.vmem [shape: bf16[128,64], index: 3, kind: input, shape index: {}]   ;;  %s2895_s4 = inlined_call_operand.vmem [shape: f32[1,64], index: 4, kind: input, shape index: {}]   ;;  %s2896_s5 = inlined_call_operand.vmem [shape: bf16[64,32], index: 5, kind: input, shape index: {}]   ;;  %s2897_s6 = inlined_call_operand.vmem [shape: f32[1,32], index: 6, kind: input, shape index: {}]   ;;  %s2898_s7 = inlined_call_operand.vmem [shape: bf16[32,16], index: 7, kind: input, shape index: {}]   ;;  %s2899_s8 = inlined_call_operand.vmem [shape: f32[1,16], index: 8, kind: input, shape index: {}]   ;;  %s2900_s9 = inlined_call_operand.vmem [shape: f32[1,16], index: 9, kind: input, shape index: {}]   ;;  %s2901_s10 = inlined_call_operand.<no memory space> [shape: f32[1,1], index: 10, kind: input, shape index: {}]   ;;  %s2902_s11 = inlined_call_operand.hbm [shape: f32[2,1,256], index: 11, kind: output, shape index: {}]  }
   0x1   :  { %v16_v0 = vstv %s2901_s10 }
   0x2   :  { %17 = vst [vmem:[#allocation2] sm:$0x1] %v16_v0 }
   0x3   :  { %18 = vsyncpa [#allocation4], 0 }
   0x4   :  { %20 = vsyncpa [#allocation4 + $0x1], 0  ;;  %s2408_s19 = smov 0   ;;  %s2410_s20 = smov 0  }
   0x5   :  { %s2412_s21 = smov 0   ;;  %s2414_s22 = smov 0  }
   0x6 LB: > { %s1895_s10 = sadd.s32 4294967295, %s2341_s22   ;;  %s1896_s23 = sadd.s32 4294967294, %s2341_s22   ;;  %s2341_s22 = sphi %s2414_s22, %s2908_s22   ;;  %s2337_s21 = sphi %s2412_s21, %s2907_s21   ;;  %s2333_s20 = sphi %s2410_s20, %s2906_s20   ;;  %s2329_s19 = sphi %s2408_s19, %s2905_s19  }
   0x7   : > { %s2431_s24 = sadd.s32 1, %s2341_s22   ;;  %s269_s25 = sadd.s32 1, %s2337_s21 }
   0x8   : > { %s266_s26 = ssub.s32 %s2341_s22, %s2431_s24  ;;  %p279_p0 = scmp.ne.s32.totalorder %s2337_s21, %s2333_s20 }
   0x9   : > { %p267_p1 = scmp.eq.s32.totalorder %s266_s26, 0  ;;  %p280_p2 = scmp.eq.s32.totalorder %s1895_s10, 1 }
   0xa   : > { %p285_p3 = scmp.ne.s32.totalorder %s2333_s20, %s2329_s19  ;;  %p286_p4 = scmp.eq.s32.totalorder %s1896_s23, 1 }
   0xb   : > { %s2441_s27 = scalar_select %p267_p1, %s2337_s21, %s269_s25  }
   0xc   : > { %p2443_p5 = por %p280_p2, %p279_p0  ;;  %p2447_p6 = por %p286_p4, %p285_p3 }
   0xd   : > { %p1899_p7 = scmp.ge.s32.totalorder %s2341_s22, 1  ;;  %p343_p8 = scmp.lt.s32.totalorder %s2341_s22, 3 }
   0xf   : > { %p344_p9 = pnand %p1899_p7, %p343_p8 }
  0x10   : > { %v2263_v1 = vld [vmem:[%s2892_s1] sm:$0xff] (!%p344_p9)   ;;  %s2456_s13 = sshll.u32 (!%p344_p9), %s1895_s10, 5  ;;  %v2264_v2 = vld [vmem:[%s2892_s1 + $0x8] sm:$0xff] (!%p344_p9)   ;;  %v2267_v5 = vld [vmem:[%s2894_s3 + $0x10] sm:$0xff] (!%p344_p9)   ;;  %vm461_vm0 = vcmask (!%p344_p9), 261120   ;;  %vm1038_vm1 = vcmask (!%p344_p9), 523264  }
  0x11   : > { %347 = sbr.rel (%p344_p9) target bundleno = 1250 (0x4e2), region = 64  ;;  %p384_p10 = scmp.lt.s32.totalorder (!%p344_p9), %s2456_s13, 63  ;;  %2059 = vmatprep.subr.bf16.mxu0 (!%p344_p9), %v2263_v1  ;;  %v2265_v3 = vld [vmem:[%s2894_s3] sm:$0xff] (!%p344_p9)   ;;  %v2266_v4 = vld [vmem:[%s2894_s3 + $0x8] sm:$0xff] (!%p344_p9)   ;;  %v2268_v15 = vld [vmem:[%s2894_s3 + $0x18] sm:$0xff] (!%p344_p9)   ;;  %vm1599_vm2 = vcmask (!%p344_p9), 130048  }
  0x12   : > { %2060 = vmatpush3.bf16.msra.mxu0 (!%p344_p9), %v2263_v1  ;;  %2095 = vmatprep.subr.bf16.mxu1 (!%p344_p9), %v2265_v3  ;;  %v2269_v20 = vld [vmem:[%s2894_s3 + $0x20] sm:$0xff] (!%p344_p9)   ;;  %v2270_v25 = vld [vmem:[%s2894_s3 + $0x28] sm:$0xff] (!%p344_p9)   ;;  %v2271_v57 = vld [vmem:[%s2894_s3 + $0x30] sm:$0xff] (!%p344_p9)   ;;  %s380_s16 = sand.u32 (!%p344_p9), 1, %s2333_s20   ;;  %s2344_s14 = smov (!%p344_p9), [#allocation3]  }
  0x13   : > { %2061 = vmatprep.subr.bf16.mxu0 (!%p344_p9), %v2264_v2  ;;  %2096 = vmatpush3.bf16.msra.mxu1 (!%p344_p9), %v2265_v3  ;;  %v2272_v58 = vld [vmem:[%s2894_s3 + $0x38] sm:$0xff] (!%p344_p9)   ;;  %v2273_v59 = vld [vmem:[%s2896_s5] sm:$0xff] (!%p344_p9)   ;;  %v2274_v60 = vld [vmem:[%s2896_s5 + $0x8] sm:$0xff] (!%p344_p9)   ;;  %s1900_s17 = sshll.u32 (!%p344_p9), %s380_s16, 1  ;;  %s1823_s26 = scalar_lea.sflag (!%p344_p9), [#allocation4], %s380_s16 }
  0x14   : > { %2097 = vmatprep.subr.bf16.mxu1 (!%p344_p9), %v2266_v4  ;;  %v2275_v61 = vld [vmem:[%s2896_s5 + $0x10] sm:$0xff] (!%p344_p9)   ;;  %v2276_v62 = vld [vmem:[%s2896_s5 + $0x18] sm:$0xff] (!%p344_p9)   ;;  %v2555_v63 = vld [vmem:[%s2893_s2] ss:$0 sm:$0xff] (!%p344_p9)  ;;  %s2283_s15 = sshll.u32 (!%p344_p9), %s2344_s14, 4  ;;  %s2284_s15 = int_to_ptr.vmem [resolvable:$false] %s2283_s15 }
  0x16   : > { %2062 = vmatpush3.bf16.msra.mxu0 (!%p344_p9), %v2264_v2 }
  0x17   : > { %2098 = vmatpush3.bf16.msra.mxu1 (!%p344_p9), %v2266_v4  ;;  %2143 = vmatprep.subr.bf16.mxu0 (!%p344_p9), %v2273_v59 }
  0x18   : > { %s385_s18 = scalar_select %p384_p10, %s2456_s13, 63  ;;  %2099 = vmatprep.subr.bf16.mxu1 %v2267_v5 }
  0x1a   : > { %s1902_s10 = sshll.u32 %s385_s18, 3 }
  0x1b   : > { %s2472_s12 = scalar_lea.vmem %s2891_s0, %s1902_s10  ;;  %2100 = vmatpush3.bf16.msra.mxu1 %v2267_v5  ;;  %s2849_s10 = scalar_lea.hbm %s2902_s11, %s2456_s13 }
  0x1c   : > { %v390_v6 = vld [vmem:[%s2472_s12] sm:$0xff]  ;;  %v391_v7 = vld [vmem:[%s2472_s12 + $0x8] sm:$0xff]  ;;  %v392_v8 = vld [vmem:[%s2472_s12 + $0x10] sm:$0xff]  ;;  %2101 = vmatprep.subr.bf16.mxu1 %v2268_v15 }
  0x1d   : > { %v422_v9 = vpack.c.bf16 %v391_v7, %v390_v6  ;;  %v393_v10 = vld [vmem:[%s2472_s12 + $0x18] sm:$0xff]  ;;  %v394_v11 = vld [vmem:[%s2472_s12 + $0x20] sm:$0xff]  ;;  %v395_v12 = vld [vmem:[%s2472_s12 + $0x28] sm:$0xff] }
  0x1e   : > { %v423_v13 = vpack.c.bf16 %v393_v10, %v392_v8  ;;  %v424_v14 = vpack.c.bf16 %v395_v12, %v394_v11  ;;  %v396_v16 = vld [vmem:[%s2472_s12 + $0x30] sm:$0xff]  ;;  %v397_v17 = vld [vmem:[%s2472_s12 + $0x38] sm:$0xff]  ;;  %v398_v18 = vld [vmem:[%s2472_s12 + $0x40] sm:$0xff] }
  0x1f   : > { %2063 = vmatprep.mubr.msk.bf16.mxu0 %vm461_vm0, %v422_v9  ;;  %v399_v19 = vld [vmem:[%s2472_s12 + $0x48] sm:$0xff]  ;;  %v425_v21 = vpack.c.bf16 %v397_v17, %v396_v16  ;;  %2102 = vmatpush3.bf16.msra.mxu1 %v2268_v15  ;;  %v400_v23 = vld [vmem:[%s2472_s12 + $0x50] sm:$0xff]  ;;  %v401_v24 = vld [vmem:[%s2472_s12 + $0x58] sm:$0xff] }
  0x20   : > { %2064 = vmatmul.mubr.msk.bf16.vlgmr.msra.gmra.mrb[0].mxu0 %vm461_vm0, %v423_v13  ;;  %v426_v22 = vpack.c.bf16 %v399_v19, %v398_v18  ;;  %2103 = vmatprep.subr.bf16.mxu1 %v2269_v20  ;;  %v402_v26 = vld [vmem:[%s2472_s12 + $0x60] sm:$0xff]  ;;  %v403_v27 = vld [vmem:[%s2472_s12 + $0x68] sm:$0xff]  ;;  %v427_v28 = vpack.c.bf16 %v401_v24, %v400_v23  ;;  %v404_v30 = vld [vmem:[%s2472_s12 + $0x70] sm:$0xff] }
  0x21   : > { %2067 = vmatprep.mubr.msk.bf16.mxu0 %vm461_vm0, %v424_v14  ;;  %v428_v29 = vpack.c.bf16 %v403_v27, %v402_v26  ;;  %v405_v31 = vld [vmem:[%s2472_s12 + $0x78] sm:$0xff]  ;;  %v406_v32 = vld [vmem:[%s2472_s12 + $0x80] sm:$0xff]  ;;  %v407_v33 = vld [vmem:[%s2472_s12 + $0x88] sm:$0xff]  ;;  %2144 = vmatpush3.bf16.msra.mxu0 %v2273_v59 }
  0x22   : > { %v429_v34 = vpack.c.bf16 %v405_v31, %v404_v30  ;;  %v430_v35 = vpack.c.bf16 %v407_v33, %v406_v32  ;;  %v408_v36 = vld [vmem:[%s2472_s12 + $0x90] sm:$0xff]  ;;  %v409_v37 = vld [vmem:[%s2472_s12 + $0x98] sm:$0xff]  ;;  %v410_v38 = vld [vmem:[%s2472_s12 + $0xa0] sm:$0xff]  ;;  %2145 = vmatprep.subr.bf16.mxu0 %v2274_v60 }
  0x23   : > { %2104 = vmatpush3.bf16.msra.mxu1 %v2269_v20  ;;  %v411_v39 = vld [vmem:[%s2472_s12 + $0xa8] sm:$0xff]  ;;  %v431_v40 = vpack.c.bf16 %v409_v37, %v408_v36  ;;  %v412_v42 = vld [vmem:[%s2472_s12 + $0xb0] sm:$0xff]  ;;  %v413_v43 = vld [vmem:[%s2472_s12 + $0xb8] sm:$0xff] }
  0x24   : > { %2105 = vmatprep.subr.bf16.mxu1 %v2270_v25  ;;  %v432_v41 = vpack.c.bf16 %v411_v39, %v410_v38  ;;  %v414_v44 = vld [vmem:[%s2472_s12 + $0xc0] sm:$0xff]  ;;  %v415_v45 = vld [vmem:[%s2472_s12 + $0xc8] sm:$0xff]  ;;  %v433_v46 = vpack.c.bf16 %v413_v43, %v412_v42  ;;  %v416_v48 = vld [vmem:[%s2472_s12 + $0xd0] sm:$0xff] }
  0x25   : > { %v434_v47 = vpack.c.bf16 %v415_v45, %v414_v44  ;;  %v417_v49 = vld [vmem:[%s2472_s12 + $0xd8] sm:$0xff]  ;;  %v418_v50 = vld [vmem:[%s2472_s12 + $0xe0] sm:$0xff]  ;;  %v419_v51 = vld [vmem:[%s2472_s12 + $0xe8] sm:$0xff]  ;;  %2146 = vmatpush3.bf16.msra.mxu0 %v2274_v60 }
  0x26   : > { %v435_v52 = vpack.c.bf16 %v417_v49, %v416_v48  ;;  %v436_v53 = vpack.c.bf16 %v419_v51, %v418_v50  ;;  %v420_v54 = vld [vmem:[%s2472_s12 + $0xf0] sm:$0xff]  ;;  %v421_v55 = vld [vmem:[%s2472_s12 + $0xf8] sm:$0xff]  ;;  %2147 = vmatprep.subr.bf16.mxu0 %v2275_v61  ;;  %s382_s12 = scalar_lea.vmem [#allocation3], %s1900_s17  ;;  %s2285_s17 = scalar_lea.vmem %s2284_s15, 64 }
  0x27   : > { %2106 = vmatpush3.bf16.msra.mxu1 %v2270_v25  ;;  %v437_v56 = vpack.c.bf16 %v421_v55, %v420_v54  ;;  %s1837_s18 = sshll.u32 %s382_s12, 4  ;;  %s2851_s18 = int_to_ptr.vmem [resolvable:$true] %s1837_s18 }
  0x28   : > { %2068 = vmatmul.mubr.msk.bf16.gmra.mrb[4].mxu0 %vm461_vm0, %v425_v21  ;;  %2107 = vmatprep.subr.bf16.mxu1 %v2271_v57  ;;  %s2279_s30 = scalar_lea.vmem %s2851_s18, 32  ;;  %p2286_p0 = scmp.lt.s32.totalorder %s2851_s18, %s2284_s15 }
  0x29   : > { %2071 = vmatprep.mubr.msk.bf16.mxu0 %vm461_vm0, %v426_v22  ;;  %2148 = vmatpush3.bf16.msra.mxu0 %v2275_v61  ;;  %p2280_p11 = scmp.ne.s32.totalorder %s2851_s18, %s2279_s30  ;;  %p2287_p1 = scmp.lt.s32.totalorder %s2285_s17, %s2279_s30 }
  0x2a   : > { %2149 = vmatprep.subr.bf16.mxu0 %v2276_v62 }
  0x2b   : > { %2108 = vmatpush3.bf16.msra.mxu1 %v2271_v57  ;;  %p2281_p12 = pnand %p2280_p11, %p2443_p5  ;;  %p2288_p2 = por %p2287_p1, %p2286_p0 }
  0x2c   : > { %2109 = vmatprep.subr.bf16.mxu1 %v2272_v58 }
  0x2d   : > { %2150 = vmatpush3.bf16.msra.mxu0 %v2276_v62  ;;  %p2282_p13 = pneg %p2281_p12 }
  0x2f   : > { %2110 = vmatpush3.bf16.msra.mxu1 %v2272_v58  ;;  %p2289_p3 = pnand %p2288_p2, %p2282_p13 }
  0x30   : > { %2072 = vmatmul.mubr.msk.bf16.gmra.mrb[8].mxu0 %vm461_vm0, %v427_v28 }
  0x31   : > { %2075 = vmatprep.mubr.msk.bf16.mxu0 %vm461_vm0, %v428_v29 }
  0x38   : > { %2076 = vmatmul.mubr.msk.bf16.gmra.mrb[12].mxu0 %vm461_vm0, %v429_v34 }
  0x39   : > { %2079 = vmatprep.mubr.msk.bf16.mxu0 %vm461_vm0, %v430_v35 }
  0x40   : > { %2080 = vmatmul.mubr.msk.bf16.gmra.mrb[16].mxu0 %vm461_vm0, %v431_v40 }
  0x41   : > { %2083 = vmatprep.mubr.msk.bf16.mxu0 %vm461_vm0, %v432_v41 }
  0x48   : > { %2084 = vmatmul.mubr.msk.bf16.gmra.mrb[20].mxu0 %vm461_vm0, %v433_v46 }
  0x49   : > { %2087 = vmatprep.mubr.msk.bf16.mxu0 %vm461_vm0, %v434_v47 }
  0x50   : > { %2088 = vmatmul.mubr.msk.bf16.gmra.mrb[24].mxu0 %vm461_vm0, %v435_v52 }
  0x51   : > { %2091 = vmatprep.mubr.msk.bf16.mxu0 %vm461_vm0, %v436_v53 }
  0x58   : > { %2092 = vmatmul.mubr.msk.bf16.gmra.mrb[28].mxu0 %vm461_vm0, %v437_v56 }
  0xf3   : > { %v2065_v0 = vpop.f32.mrb[0].mxu0 }
  0xf4   : > { %v553_v1 = vadd.f32 %v2065_v0, %v2555_v63  ;;  %v544_v2 = vpop.f32.mrb[1].mxu0 }
  0xf5   : > { %v545_v3 = vadd.f32 %v2555_v63, %v544_v2  ;;  %v2066_v4 = vpop.f32.mrb[2].mxu0 }
  0xf6   : > { %v556_v5 = vadd.f32 %v2066_v4, %v2555_v63  ;;  %v547_v6 = vpop.f32.mrb[3].mxu0  ;;  %v673_v8 = vmax.f32 %v553_v1, 0.0 }
  0xf7   : > { %v548_v7 = vadd.f32 %v2555_v63, %v547_v6  ;;  %v671_v10 = vmax.f32 %v545_v3, 0.0 }
  0xf8   : > { %v674_v9 = vmax.f32 %v556_v5, 0.0 }
  0xf9   : > { %v672_v11 = vmax.f32 %v548_v7, 0.0 }
  0xfa   : > { %v704_v12 = vpack.c.bf16 %v674_v9, %v673_v8 }
  0xfb   : > { %v2069_v13 = vpop.f32.mrb[4].mxu0  ;;  %v703_v14 = vpack.c.bf16 %v672_v11, %v671_v10 }
  0xfc   : > { %v569_v15 = vadd.f32 %v2069_v13, %v2555_v63  ;;  %v560_v16 = vpop.f32.mrb[5].mxu0 }
  0xfd   : > { %v561_v17 = vadd.f32 %v2555_v63, %v560_v16  ;;  %v2070_v18 = vpop.f32.mrb[6].mxu0  ;;  %2111 = vmatprep.mubr.bf16.mxu1 %v703_v14 }
  0xfe   : > { %v572_v19 = vadd.f32 %v2070_v18, %v2555_v63  ;;  %v563_v20 = vpop.f32.mrb[7].mxu0  ;;  %2112 = vmatmul.mubr.bf16.vlgmr.msra.gmra.mrb[0].mxu1 %v704_v12  ;;  %v677_v22 = vmax.f32 %v569_v15, 0.0 }
  0xff   : > { %v564_v21 = vadd.f32 %v2555_v63, %v563_v20  ;;  %v675_v24 = vmax.f32 %v561_v17, 0.0 }
 0x100   : > { %v678_v23 = vmax.f32 %v572_v19, 0.0 }
 0x101   : > { %v676_v25 = vmax.f32 %v564_v21, 0.0 }
 0x102   : > { %v706_v26 = vpack.c.bf16 %v678_v23, %v677_v22 }
 0x103   : > { %v705_v27 = vpack.c.bf16 %v676_v25, %v675_v24  ;;  %v2073_v28 = vpop.f32.mrb[8].mxu0 }
 0x104   : > { %v585_v29 = vadd.f32 %v2073_v28, %v2555_v63  ;;  %v576_v30 = vpop.f32.mrb[9].mxu0 }
 0x105   : > { %v577_v31 = vadd.f32 %v2555_v63, %v576_v30  ;;  %v2074_v32 = vpop.f32.mrb[10].mxu0  ;;  %2115 = vmatprep.mubr.bf16.mxu1 %v705_v27 }
 0x106   : > { %v588_v33 = vadd.f32 %v2074_v32, %v2555_v63  ;;  %v579_v34 = vpop.f32.mrb[11].mxu0  ;;  %2116 = vmatmul.mubr.bf16.gmra.mrb[4].mxu1 %v706_v26  ;;  %v681_v36 = vmax.f32 %v585_v29, 0.0 }
 0x107   : > { %v580_v35 = vadd.f32 %v2555_v63, %v579_v34  ;;  %v679_v38 = vmax.f32 %v577_v31, 0.0 }
 0x108   : > { %v682_v37 = vmax.f32 %v588_v33, 0.0 }
 0x109   : > { %v680_v39 = vmax.f32 %v580_v35, 0.0 }
 0x10a   : > { %v708_v40 = vpack.c.bf16 %v682_v37, %v681_v36 }
 0x10b   : > { %v707_v41 = vpack.c.bf16 %v680_v39, %v679_v38  ;;  %v2077_v42 = vpop.f32.mrb[12].mxu0 }
 0x10c   : > { %v601_v43 = vadd.f32 %v2077_v42, %v2555_v63  ;;  %v592_v44 = vpop.f32.mrb[13].mxu0 }
 0x10d   : > { %v593_v45 = vadd.f32 %v2555_v63, %v592_v44  ;;  %v2078_v46 = vpop.f32.mrb[14].mxu0  ;;  %2119 = vmatprep.mubr.bf16.mxu1 %v707_v41 }
 0x10e   : > { %v604_v47 = vadd.f32 %v2078_v46, %v2555_v63  ;;  %v595_v48 = vpop.f32.mrb[15].mxu0  ;;  %2120 = vmatmul.mubr.bf16.gmra.mrb[8].mxu1 %v708_v40  ;;  %v685_v50 = vmax.f32 %v601_v43, 0.0 }
 0x10f   : > { %v596_v49 = vadd.f32 %v2555_v63, %v595_v48  ;;  %v683_v52 = vmax.f32 %v593_v45, 0.0 }
 0x110   : > { %v686_v51 = vmax.f32 %v604_v47, 0.0 }
 0x111   : > { %v684_v53 = vmax.f32 %v596_v49, 0.0  ;;  %v2277_v49 = vld [vmem:[%s2898_s7] sm:$0xff]  }
 0x112   : > { %v710_v54 = vpack.c.bf16 %v686_v51, %v685_v50  ;;  %2219 = vmatprep.subr.bf16.mxu1 %v2277_v49  ;;  %2183 = vmatprep.subr.bf16.mxu0 %v2277_v49  ;;  %v2278_v50 = vld [vmem:[%s2898_s7 + $0x8] sm:$0xff]  }
 0x113   : > { %v709_v55 = vpack.c.bf16 %v684_v53, %v683_v52  ;;  %v2081_v56 = vpop.f32.mrb[16].mxu0  ;;  %2221 = vmatpush3.bf16.msra.mxu1 %v2277_v49 }
 0x114   : > { %v617_v57 = vadd.f32 %v2081_v56, %v2555_v63  ;;  %v608_v58 = vpop.f32.mrb[17].mxu0  ;;  %2220 = vmatprep.subr.bf16.mxu1 %v2278_v50 }
 0x115   : > { %v609_v59 = vadd.f32 %v2555_v63, %v608_v58  ;;  %v2082_v60 = vpop.f32.mrb[18].mxu0  ;;  %2123 = vmatprep.mubr.bf16.mxu1 %v709_v55 }
 0x116   : > { %v620_v61 = vadd.f32 %v2082_v60, %v2555_v63  ;;  %v611_v62 = vpop.f32.mrb[19].mxu0  ;;  %2124 = vmatmul.mubr.bf16.gmra.mrb[12].mxu1 %v710_v54  ;;  %v689_v1 = vmax.f32 %v617_v57, 0.0 }
 0x117   : > { %v612_v0 = vadd.f32 %v2555_v63, %v611_v62  ;;  %v687_v3 = vmax.f32 %v609_v59, 0.0  ;;  %2222 = vmatpush3.bf16.msra.mxu1 %v2278_v50 }
 0x118   : > { %v690_v2 = vmax.f32 %v620_v61, 0.0 }
 0x119   : > { %v688_v4 = vmax.f32 %v612_v0, 0.0 }
 0x11a   : > { %v712_v5 = vpack.c.bf16 %v690_v2, %v689_v1 }
 0x11b   : > { %v711_v6 = vpack.c.bf16 %v688_v4, %v687_v3  ;;  %v2085_v7 = vpop.f32.mrb[20].mxu0 }
 0x11c   : > { %v633_v8 = vadd.f32 %v2085_v7, %v2555_v63  ;;  %v624_v9 = vpop.f32.mrb[21].mxu0 }
 0x11d   : > { %v625_v10 = vadd.f32 %v2555_v63, %v624_v9  ;;  %v2086_v11 = vpop.f32.mrb[22].mxu0  ;;  %2127 = vmatprep.mubr.bf16.mxu1 %v711_v6 }
 0x11e   : > { %v693_v12 = vmax.f32 %v633_v8, 0.0  ;;  %v636_v13 = vadd.f32 %v2086_v11, %v2555_v63  ;;  %v627_v14 = vpop.f32.mrb[23].mxu0  ;;  %2128 = vmatmul.mubr.bf16.gmra.mrb[16].mxu1 %v712_v5 }
 0x11f   : > { %v691_v15 = vmax.f32 %v625_v10, 0.0  ;;  %v628_v16 = vadd.f32 %v2555_v63, %v627_v14 }
 0x120   : > { %v694_v17 = vmax.f32 %v636_v13, 0.0 }
 0x121   : > { %v692_v18 = vmax.f32 %v628_v16, 0.0 }
 0x122   : > { %v714_v19 = vpack.c.bf16 %v694_v17, %v693_v12 }
 0x123   : > { %v713_v20 = vpack.c.bf16 %v692_v18, %v691_v15  ;;  %v2089_v21 = vpop.f32.mrb[24].mxu0 }
 0x124   : > { %v649_v22 = vadd.f32 %v2089_v21, %v2555_v63  ;;  %v640_v23 = vpop.f32.mrb[25].mxu0 }
 0x125   : > { %v641_v24 = vadd.f32 %v2555_v63, %v640_v23  ;;  %2131 = vmatprep.mubr.bf16.mxu1 %v713_v20  ;;  %v2090_v25 = vpop.f32.mrb[26].mxu0 }
 0x126   : > { %v697_v26 = vmax.f32 %v649_v22, 0.0  ;;  %v652_v27 = vadd.f32 %v2090_v25, %v2555_v63  ;;  %2132 = vmatmul.mubr.bf16.gmra.mrb[20].mxu1 %v714_v19  ;;  %v643_v28 = vpop.f32.mrb[27].mxu0 }
 0x127   : > { %v695_v29 = vmax.f32 %v641_v24, 0.0  ;;  %v644_v30 = vadd.f32 %v2555_v63, %v643_v28 }
 0x128   : > { %v698_v31 = vmax.f32 %v652_v27, 0.0 }
 0x129   : > { %v696_v32 = vmax.f32 %v644_v30, 0.0 }
 0x12a   : > { %v716_v33 = vpack.c.bf16 %v698_v31, %v697_v26 }
 0x12b   : > { %v715_v34 = vpack.c.bf16 %v696_v32, %v695_v29  ;;  %v2093_v35 = vpop.f32.mrb[28].mxu0 }
 0x12c   : > { %v665_v36 = vadd.f32 %v2093_v35, %v2555_v63  ;;  %v656_v37 = vpop.f32.mrb[29].mxu0 }
 0x12d   : > { %2135 = vmatprep.mubr.bf16.mxu1 %v715_v34  ;;  %v657_v38 = vadd.f32 %v2555_v63, %v656_v37  ;;  %v2094_v39 = vpop.f32.mrb[30].mxu0 }
 0x12e   : > { %2136 = vmatmul.mubr.bf16.gmra.mrb[24].mxu1 %v716_v33  ;;  %v701_v40 = vmax.f32 %v665_v36, 0.0  ;;  %v668_v41 = vadd.f32 %v2094_v39, %v2555_v63  ;;  %v659_v42 = vpop.f32.mrb[31].mxu0 }
 0x12f   : > { %v699_v43 = vmax.f32 %v657_v38, 0.0  ;;  %v660_v44 = vadd.f32 %v2555_v63, %v659_v42  ;;  %v2598_v63 = vld [vmem:[%s2895_s4] ss:$0 sm:$0xff] }
 0x130   : > { %v702_v45 = vmax.f32 %v668_v41, 0.0 }
 0x131   : > { %v700_v46 = vmax.f32 %v660_v44, 0.0 }
 0x132   : > { %v718_v47 = vpack.c.bf16 %v702_v45, %v701_v40 }
 0x133   : > { %v717_v48 = vpack.c.bf16 %v700_v46, %v699_v43 }
 0x135   : > { %2139 = vmatprep.mubr.bf16.mxu1 %v717_v48 }
 0x136   : > { %2140 = vmatmul.mubr.bf16.gmra.mrb[28].mxu1 %v718_v47 }
 0x1d1   : > { %v2113_v51 = vpop.f32.mrb[0].mxu1 }
 0x1d2   : > { %v833_v52 = vadd.f32 %v2113_v51, %v2598_v63  ;;  %v824_v53 = vpop.f32.mrb[1].mxu1 }
 0x1d3   : > { %v825_v54 = vadd.f32 %v2598_v63, %v824_v53  ;;  %v2114_v55 = vpop.f32.mrb[2].mxu1 }
 0x1d4   : > { %v836_v56 = vadd.f32 %v2114_v55, %v2598_v63  ;;  %v827_v57 = vpop.f32.mrb[3].mxu1  ;;  %v953_v59 = vmax.f32 %v833_v52, 0.0 }
 0x1d5   : > { %v828_v58 = vadd.f32 %v2598_v63, %v827_v57  ;;  %v951_v61 = vmax.f32 %v825_v54, 0.0 }
 0x1d6   : > { %v954_v60 = vmax.f32 %v836_v56, 0.0 }
 0x1d7   : > { %v952_v62 = vmax.f32 %v828_v58, 0.0 }
 0x1d8   : > { %v984_v0 = vpack.c.bf16 %v954_v60, %v953_v59 }
 0x1d9   : > { %v983_v1 = vpack.c.bf16 %v952_v62, %v951_v61  ;;  %v2117_v2 = vpop.f32.mrb[4].mxu1 }
 0x1da   : > { %v849_v3 = vadd.f32 %v2117_v2, %v2598_v63  ;;  %v840_v4 = vpop.f32.mrb[5].mxu1 }
 0x1db   : > { %v841_v5 = vadd.f32 %v2598_v63, %v840_v4  ;;  %v2118_v6 = vpop.f32.mrb[6].mxu1  ;;  %2151 = vmatprep.mubr.msk.bf16.mxu0 %vm1038_vm1, %v983_v1 }
 0x1dc   : > { %v852_v7 = vadd.f32 %v2118_v6, %v2598_v63  ;;  %v843_v8 = vpop.f32.mrb[7].mxu1  ;;  %2152 = vmatmul.mubr.msk.bf16.vlgmr.msra.gmra.mrb[32].mxu0 %vm1038_vm1, %v984_v0  ;;  %v957_v10 = vmax.f32 %v849_v3, 0.0 }
 0x1dd   : > { %v844_v9 = vadd.f32 %v2598_v63, %v843_v8  ;;  %2184 = vmatpush3.bf16.msra.mxu0 %v2277_v49  ;;  %v955_v12 = vmax.f32 %v841_v5, 0.0 }
 0x1de   : > { %v958_v11 = vmax.f32 %v852_v7, 0.0  ;;  %2185 = vmatprep.subr.bf16.mxu0 %v2278_v50 }
 0x1df   : > { %v956_v13 = vmax.f32 %v844_v9, 0.0 }
 0x1e0   : > { %v986_v14 = vpack.c.bf16 %v958_v11, %v957_v10 }
 0x1e1   : > { %v985_v15 = vpack.c.bf16 %v956_v13, %v955_v12  ;;  %v2121_v16 = vpop.f32.mrb[8].mxu1  ;;  %2186 = vmatpush3.bf16.msra.mxu0 %v2278_v50 }
 0x1e2   : > { %v865_v17 = vadd.f32 %v2121_v16, %v2598_v63  ;;  %v856_v18 = vpop.f32.mrb[9].mxu1 }
 0x1e3   : > { %v857_v19 = vadd.f32 %v2598_v63, %v856_v18  ;;  %v2122_v20 = vpop.f32.mrb[10].mxu1  ;;  %2155 = vmatprep.mubr.msk.bf16.mxu0 %vm1038_vm1, %v985_v15 }
 0x1e4   : > { %v868_v21 = vadd.f32 %v2122_v20, %v2598_v63  ;;  %v859_v22 = vpop.f32.mrb[11].mxu1  ;;  %2156 = vmatmul.mubr.msk.bf16.gmra.mrb[36].mxu0 %vm1038_vm1, %v986_v14  ;;  %v961_v24 = vmax.f32 %v865_v17, 0.0 }
 0x1e5   : > { %v860_v23 = vadd.f32 %v2598_v63, %v859_v22  ;;  %v959_v26 = vmax.f32 %v857_v19, 0.0 }
 0x1e6   : > { %v962_v25 = vmax.f32 %v868_v21, 0.0 }
 0x1e7   : > { %v960_v27 = vmax.f32 %v860_v23, 0.0 }
 0x1e8   : > { %v988_v28 = vpack.c.bf16 %v962_v25, %v961_v24 }
 0x1e9   : > { %v987_v29 = vpack.c.bf16 %v960_v27, %v959_v26  ;;  %v2125_v30 = vpop.f32.mrb[12].mxu1 }
 0x1ea   : > { %v881_v31 = vadd.f32 %v2125_v30, %v2598_v63  ;;  %v872_v32 = vpop.f32.mrb[13].mxu1 }
 0x1eb   : > { %v873_v33 = vadd.f32 %v2598_v63, %v872_v32  ;;  %v2126_v34 = vpop.f32.mrb[14].mxu1  ;;  %2159 = vmatprep.mubr.msk.bf16.mxu0 %vm1038_vm1, %v987_v29 }
 0x1ec   : > { %v884_v35 = vadd.f32 %v2126_v34, %v2598_v63  ;;  %v875_v36 = vpop.f32.mrb[15].mxu1  ;;  %2160 = vmatmul.mubr.msk.bf16.gmra.mrb[40].mxu0 %vm1038_vm1, %v988_v28  ;;  %v965_v38 = vmax.f32 %v881_v31, 0.0 }
 0x1ed   : > { %v876_v37 = vadd.f32 %v2598_v63, %v875_v36  ;;  %v963_v40 = vmax.f32 %v873_v33, 0.0 }
 0x1ee   : > { %v966_v39 = vmax.f32 %v884_v35, 0.0 }
 0x1ef   : > { %v964_v41 = vmax.f32 %v876_v37, 0.0  ;;  %v2651_v37 = vld [vmem:[%s2897_s6] ss:$0 sm:$0xff] }
 0x1f0   : > { %v990_v42 = vpack.c.bf16 %v966_v39, %v965_v38 }
 0x1f1   : > { %v989_v43 = vpack.c.bf16 %v964_v41, %v963_v40  ;;  %v2129_v44 = vpop.f32.mrb[16].mxu1 }
 0x1f2   : > { %v897_v45 = vadd.f32 %v2129_v44, %v2598_v63  ;;  %v888_v46 = vpop.f32.mrb[17].mxu1 }
 0x1f3   : > { %v889_v47 = vadd.f32 %v2598_v63, %v888_v46  ;;  %v2130_v48 = vpop.f32.mrb[18].mxu1  ;;  %2163 = vmatprep.mubr.msk.bf16.mxu0 %vm1038_vm1, %v989_v43 }
 0x1f4   : > { %v900_v49 = vadd.f32 %v2130_v48, %v2598_v63  ;;  %v891_v50 = vpop.f32.mrb[19].mxu1  ;;  %2164 = vmatmul.mubr.msk.bf16.gmra.mrb[44].mxu0 %vm1038_vm1, %v990_v42  ;;  %v969_v52 = vmax.f32 %v897_v45, 0.0 }
 0x1f5   : > { %v892_v51 = vadd.f32 %v2598_v63, %v891_v50  ;;  %v967_v54 = vmax.f32 %v889_v47, 0.0 }
 0x1f6   : > { %v970_v53 = vmax.f32 %v900_v49, 0.0 }
 0x1f7   : > { %v968_v55 = vmax.f32 %v892_v51, 0.0 }
 0x1f8   : > { %v992_v56 = vpack.c.bf16 %v970_v53, %v969_v52 }
 0x1f9   : > { %v991_v57 = vpack.c.bf16 %v968_v55, %v967_v54  ;;  %v2133_v58 = vpop.f32.mrb[20].mxu1 }
 0x1fa   : > { %v913_v59 = vadd.f32 %v2133_v58, %v2598_v63  ;;  %v904_v60 = vpop.f32.mrb[21].mxu1 }
 0x1fb   : > { %v905_v61 = vadd.f32 %v2598_v63, %v904_v60  ;;  %v2134_v62 = vpop.f32.mrb[22].mxu1  ;;  %2167 = vmatprep.mubr.msk.bf16.mxu0 %vm1038_vm1, %v991_v57 }
 0x1fc   : > { %v973_v0 = vmax.f32 %v913_v59, 0.0  ;;  %v916_v1 = vadd.f32 %v2134_v62, %v2598_v63  ;;  %v907_v2 = vpop.f32.mrb[23].mxu1  ;;  %2168 = vmatmul.mubr.msk.bf16.gmra.mrb[48].mxu0 %vm1038_vm1, %v992_v56 }
 0x1fd   : > { %v971_v3 = vmax.f32 %v905_v61, 0.0  ;;  %v908_v4 = vadd.f32 %v2598_v63, %v907_v2 }
 0x1fe   : > { %v974_v5 = vmax.f32 %v916_v1, 0.0 }
 0x1ff   : > { %v972_v6 = vmax.f32 %v908_v4, 0.0 }
 0x200   : > { %v994_v7 = vpack.c.bf16 %v974_v5, %v973_v0 }
 0x201   : > { %v993_v8 = vpack.c.bf16 %v972_v6, %v971_v3  ;;  %v2137_v9 = vpop.f32.mrb[24].mxu1 }
 0x202   : > { %v929_v10 = vadd.f32 %v2137_v9, %v2598_v63  ;;  %v920_v11 = vpop.f32.mrb[25].mxu1 }
 0x203   : > { %v921_v12 = vadd.f32 %v2598_v63, %v920_v11  ;;  %2171 = vmatprep.mubr.msk.bf16.mxu0 %vm1038_vm1, %v993_v8  ;;  %v2138_v13 = vpop.f32.mrb[26].mxu1 }
 0x204   : > { %v977_v14 = vmax.f32 %v929_v10, 0.0  ;;  %v932_v15 = vadd.f32 %v2138_v13, %v2598_v63  ;;  %2172 = vmatmul.mubr.msk.bf16.gmra.mrb[52].mxu0 %vm1038_vm1, %v994_v7  ;;  %v923_v16 = vpop.f32.mrb[27].mxu1 }
 0x205   : > { %v975_v17 = vmax.f32 %v921_v12, 0.0  ;;  %v924_v18 = vadd.f32 %v2598_v63, %v923_v16 }
 0x206   : > { %v978_v19 = vmax.f32 %v932_v15, 0.0 }
 0x207   : > { %v976_v20 = vmax.f32 %v924_v18, 0.0 }
 0x208   : > { %v996_v21 = vpack.c.bf16 %v978_v19, %v977_v14 }
 0x209   : > { %v995_v22 = vpack.c.bf16 %v976_v20, %v975_v17  ;;  %v2141_v23 = vpop.f32.mrb[28].mxu1 }
 0x20a   : > { %v945_v24 = vadd.f32 %v2141_v23, %v2598_v63  ;;  %v936_v25 = vpop.f32.mrb[29].mxu1 }
 0x20b   : > { %2175 = vmatprep.mubr.msk.bf16.mxu0 %vm1038_vm1, %v995_v22  ;;  %v937_v26 = vadd.f32 %v2598_v63, %v936_v25  ;;  %v2142_v27 = vpop.f32.mrb[30].mxu1 }
 0x20c   : > { %2176 = vmatmul.mubr.msk.bf16.gmra.mrb[56].mxu0 %vm1038_vm1, %v996_v21  ;;  %v981_v28 = vmax.f32 %v945_v24, 0.0  ;;  %v948_v29 = vadd.f32 %v2142_v27, %v2598_v63  ;;  %v939_v30 = vpop.f32.mrb[31].mxu1 }
 0x20d   : > { %v979_v31 = vmax.f32 %v937_v26, 0.0  ;;  %v940_v32 = vadd.f32 %v2598_v63, %v939_v30 }
 0x20e   : > { %v982_v33 = vmax.f32 %v948_v29, 0.0 }
 0x20f   : > { %v980_v34 = vmax.f32 %v940_v32, 0.0 }
 0x210   : > { %v998_v35 = vpack.c.bf16 %v982_v33, %v981_v28 }
 0x211   : > { %v997_v36 = vpack.c.bf16 %v980_v34, %v979_v31 }
 0x213   : > { %2179 = vmatprep.mubr.msk.bf16.mxu0 %vm1038_vm1, %v997_v36 }
 0x214   : > { %2180 = vmatmul.mubr.msk.bf16.gmra.mrb[60].mxu0 %vm1038_vm1, %v998_v35 }
 0x2af   : > { %v2153_v38 = vpop.f32.mrb[32].mxu0 }
 0x2b0   : > { %v1130_v39 = vadd.f32 %v2153_v38, %v2651_v37  ;;  %v1121_v40 = vpop.f32.mrb[33].mxu0 }
 0x2b1   : > { %v1122_v41 = vadd.f32 %v2651_v37, %v1121_v40  ;;  %v2154_v63 = vpop.f32.mrb[34].mxu0 }
 0x2b2   : > { %v1133_v42 = vadd.f32 %v2154_v63, %v2651_v37  ;;  %v1124_v43 = vpop.f32.mrb[35].mxu0  ;;  %v1250_v45 = vmax.f32 %v1130_v39, 0.0 }
 0x2b3   : > { %v1125_v44 = vadd.f32 %v2651_v37, %v1124_v43  ;;  %v1248_v47 = vmax.f32 %v1122_v41, 0.0 }
 0x2b4   : > { %v1251_v46 = vmax.f32 %v1133_v42, 0.0 }
 0x2b5   : > { %v1249_v48 = vmax.f32 %v1125_v44, 0.0 }
 0x2b6   : > { %v1281_v49 = vpack.c.bf16 %v1251_v46, %v1250_v45 }
 0x2b7   : > { %v1280_v50 = vpack.c.bf16 %v1249_v48, %v1248_v47  ;;  %v2157_v51 = vpop.f32.mrb[36].mxu0 }
 0x2b8   : > { %v1146_v52 = vadd.f32 %v2157_v51, %v2651_v37  ;;  %v1137_v53 = vpop.f32.mrb[37].mxu0 }
 0x2b9   : > { %v1138_v54 = vadd.f32 %v2651_v37, %v1137_v53  ;;  %v2158_v55 = vpop.f32.mrb[38].mxu0  ;;  %2187 = vmatprep.mubr.msk.bf16.mxu0 %vm461_vm0, %v1280_v50 }
 0x2ba   : > { %v1149_v56 = vadd.f32 %v2158_v55, %v2651_v37  ;;  %v1140_v57 = vpop.f32.mrb[39].mxu0  ;;  %2188 = vmatmul.mubr.msk.bf16.vlgmr.msra.gmra.mrb[64].mxu0 %vm461_vm0, %v1281_v49  ;;  %v1254_v59 = vmax.f32 %v1146_v52, 0.0 }
 0x2bb   : > { %v1141_v58 = vadd.f32 %v2651_v37, %v1140_v57  ;;  %v1252_v61 = vmax.f32 %v1138_v54, 0.0 }
 0x2bc   : > { %v1255_v60 = vmax.f32 %v1149_v56, 0.0 }
 0x2bd   : > { %v1253_v62 = vmax.f32 %v1141_v58, 0.0 }
 0x2be   : > { %v1283_v0 = vpack.c.bf16 %v1255_v60, %v1254_v59 }
 0x2bf   : > { %v1282_v1 = vpack.c.bf16 %v1253_v62, %v1252_v61  ;;  %v2161_v2 = vpop.f32.mrb[40].mxu0 }
 0x2c0   : > { %v1162_v3 = vadd.f32 %v2161_v2, %v2651_v37  ;;  %v1153_v4 = vpop.f32.mrb[41].mxu0 }
 0x2c1   : > { %v1154_v5 = vadd.f32 %v2651_v37, %v1153_v4  ;;  %v2162_v6 = vpop.f32.mrb[42].mxu0  ;;  %2191 = vmatprep.mubr.msk.bf16.mxu1 %vm461_vm0, %v1282_v1 }
 0x2c2   : > { %v1165_v7 = vadd.f32 %v2162_v6, %v2651_v37  ;;  %v1156_v8 = vpop.f32.mrb[43].mxu0  ;;  %2192 = vmatmul.mubr.msk.bf16.vlgmr.msra.gmra.mrb[32].mxu1 %vm461_vm0, %v1283_v0  ;;  %v1258_v10 = vmax.f32 %v1162_v3, 0.0 }
 0x2c3   : > { %v1157_v9 = vadd.f32 %v2651_v37, %v1156_v8  ;;  %v1256_v12 = vmax.f32 %v1154_v5, 0.0 }
 0x2c4   : > { %v1259_v11 = vmax.f32 %v1165_v7, 0.0 }
 0x2c5   : > { %v1257_v13 = vmax.f32 %v1157_v9, 0.0 }
 0x2c6   : > { %v1285_v14 = vpack.c.bf16 %v1259_v11, %v1258_v10 }
 0x2c7   : > { %v1284_v15 = vpack.c.bf16 %v1257_v13, %v1256_v12  ;;  %v2165_v16 = vpop.f32.mrb[44].mxu0 }
 0x2c8   : > { %v1178_v17 = vadd.f32 %v2165_v16, %v2651_v37  ;;  %v1169_v18 = vpop.f32.mrb[45].mxu0 }
 0x2c9   : > { %v1170_v19 = vadd.f32 %v2651_v37, %v1169_v18  ;;  %v2166_v20 = vpop.f32.mrb[46].mxu0  ;;  %2195 = vmatprep.mubr.msk.bf16.mxu1 %vm461_vm0, %v1284_v15 }
 0x2ca   : > { %v1181_v21 = vadd.f32 %v2166_v20, %v2651_v37  ;;  %v1172_v22 = vpop.f32.mrb[47].mxu0  ;;  %2196 = vmatmul.mubr.msk.bf16.gmra.mrb[36].mxu1 %vm461_vm0, %v1285_v14  ;;  %v1262_v24 = vmax.f32 %v1178_v17, 0.0 }
 0x2cb   : > { %v1173_v23 = vadd.f32 %v2651_v37, %v1172_v22  ;;  %v1260_v26 = vmax.f32 %v1170_v19, 0.0 }
 0x2cc   : > { %v1263_v25 = vmax.f32 %v1181_v21, 0.0 }
 0x2cd   : > { %v1261_v27 = vmax.f32 %v1173_v23, 0.0  ;;  %v2704_v23 = vld [vmem:[%s2899_s8] ss:$0 sm:$0xff] }
 0x2ce   : > { %v1287_v28 = vpack.c.bf16 %v1263_v25, %v1262_v24 }
 0x2cf   : > { %v1286_v29 = vpack.c.bf16 %v1261_v27, %v1260_v26  ;;  %v2169_v30 = vpop.f32.mrb[48].mxu0 }
 0x2d0   : > { %v1194_v31 = vadd.f32 %v2169_v30, %v2651_v37  ;;  %v1185_v32 = vpop.f32.mrb[49].mxu0 }
 0x2d1   : > { %v1186_v33 = vadd.f32 %v2651_v37, %v1185_v32  ;;  %v2170_v34 = vpop.f32.mrb[50].mxu0  ;;  %2199 = vmatprep.mubr.msk.bf16.mxu1 %vm461_vm0, %v1286_v29 }
 0x2d2   : > { %v1197_v35 = vadd.f32 %v2170_v34, %v2651_v37  ;;  %v1188_v36 = vpop.f32.mrb[51].mxu0  ;;  %2200 = vmatmul.mubr.msk.bf16.gmra.mrb[40].mxu1 %vm461_vm0, %v1287_v28  ;;  %v1266_v39 = vmax.f32 %v1194_v31, 0.0  ;;  %v2711_v28 = vld [vmem:[%s2900_s9] ss:$0 sm:$0xff] }
 0x2d3   : > { %v1189_v38 = vadd.f32 %v2651_v37, %v1188_v36  ;;  %v1264_v41 = vmax.f32 %v1186_v33, 0.0 }
 0x2d4   : > { %v1267_v40 = vmax.f32 %v1197_v35, 0.0 }
 0x2d5   : > { %v1265_v63 = vmax.f32 %v1189_v38, 0.0 }
 0x2d6   : > { %v1289_v42 = vpack.c.bf16 %v1267_v40, %v1266_v39 }
 0x2d7   : > { %v1288_v43 = vpack.c.bf16 %v1265_v63, %v1264_v41  ;;  %v2173_v44 = vpop.f32.mrb[52].mxu0 }
 0x2d8   : > { %v1210_v45 = vadd.f32 %v2173_v44, %v2651_v37  ;;  %v1201_v46 = vpop.f32.mrb[53].mxu0 }
 0x2d9   : > { %v1202_v47 = vadd.f32 %v2651_v37, %v1201_v46  ;;  %v2174_v48 = vpop.f32.mrb[54].mxu0  ;;  %2203 = vmatprep.mubr.msk.bf16.mxu1 %vm461_vm0, %v1288_v43 }
 0x2da   : > { %v1213_v49 = vadd.f32 %v2174_v48, %v2651_v37  ;;  %v1204_v50 = vpop.f32.mrb[55].mxu0  ;;  %2204 = vmatmul.mubr.msk.bf16.gmra.mrb[44].mxu1 %vm461_vm0, %v1289_v42  ;;  %v1270_v52 = vmax.f32 %v1210_v45, 0.0 }
 0x2db   : > { %v1205_v51 = vadd.f32 %v2651_v37, %v1204_v50  ;;  %v1268_v54 = vmax.f32 %v1202_v47, 0.0 }
 0x2dc   : > { %v1271_v53 = vmax.f32 %v1213_v49, 0.0 }
 0x2dd   : > { %v1269_v55 = vmax.f32 %v1205_v51, 0.0 }
 0x2de   : > { %v1291_v56 = vpack.c.bf16 %v1271_v53, %v1270_v52 }
 0x2df   : > { %v1290_v57 = vpack.c.bf16 %v1269_v55, %v1268_v54  ;;  %v2177_v58 = vpop.f32.mrb[56].mxu0 }
 0x2e0   : > { %v1226_v59 = vadd.f32 %v2177_v58, %v2651_v37  ;;  %v1217_v60 = vpop.f32.mrb[57].mxu0 }
 0x2e1   : > { %v1218_v61 = vadd.f32 %v2651_v37, %v1217_v60  ;;  %2207 = vmatprep.mubr.msk.bf16.mxu1 %vm461_vm0, %v1290_v57  ;;  %v2178_v62 = vpop.f32.mrb[58].mxu0 }
 0x2e2   : > { %v1274_v0 = vmax.f32 %v1226_v59, 0.0  ;;  %v1229_v1 = vadd.f32 %v2178_v62, %v2651_v37  ;;  %2208 = vmatmul.mubr.msk.bf16.gmra.mrb[48].mxu1 %vm461_vm0, %v1291_v56  ;;  %v1220_v2 = vpop.f32.mrb[59].mxu0 }
 0x2e3   : > { %v1272_v3 = vmax.f32 %v1218_v61, 0.0  ;;  %v1221_v4 = vadd.f32 %v2651_v37, %v1220_v2 }
 0x2e4   : > { %v1275_v5 = vmax.f32 %v1229_v1, 0.0 }
 0x2e5   : > { %v1273_v6 = vmax.f32 %v1221_v4, 0.0 }
 0x2e6   : > { %v1293_v7 = vpack.c.bf16 %v1275_v5, %v1274_v0 }
 0x2e7   : > { %v1292_v8 = vpack.c.bf16 %v1273_v6, %v1272_v3  ;;  %v2181_v9 = vpop.f32.mrb[60].mxu0 }
 0x2e8   : > { %v1242_v10 = vadd.f32 %v2181_v9, %v2651_v37  ;;  %v1233_v11 = vpop.f32.mrb[61].mxu0 }
 0x2e9   : > { %2211 = vmatprep.mubr.msk.bf16.mxu1 %vm461_vm0, %v1292_v8  ;;  %v1234_v12 = vadd.f32 %v2651_v37, %v1233_v11  ;;  %v2182_v13 = vpop.f32.mrb[62].mxu0 }
 0x2ea   : > { %2212 = vmatmul.mubr.msk.bf16.gmra.mrb[52].mxu1 %vm461_vm0, %v1293_v7  ;;  %v1278_v14 = vmax.f32 %v1242_v10, 0.0  ;;  %v1245_v15 = vadd.f32 %v2182_v13, %v2651_v37  ;;  %v1236_v16 = vpop.f32.mrb[63].mxu0 }
 0x2eb   : > { %v1276_v17 = vmax.f32 %v1234_v12, 0.0  ;;  %v1237_v18 = vadd.f32 %v2651_v37, %v1236_v16 }
 0x2ec   : > { %v1279_v19 = vmax.f32 %v1245_v15, 0.0 }
 0x2ed   : > { %v1277_v20 = vmax.f32 %v1237_v18, 0.0 }
 0x2ee   : > { %v1295_v21 = vpack.c.bf16 %v1279_v19, %v1278_v14 }
 0x2ef   : > { %v1294_v22 = vpack.c.bf16 %v1277_v20, %v1276_v17 }
 0x2f1   : > { %2215 = vmatprep.mubr.msk.bf16.mxu1 %vm461_vm0, %v1294_v22 }
 0x2f2   : > { %2216 = vmatmul.mubr.msk.bf16.gmra.mrb[56].mxu1 %vm461_vm0, %v1295_v21 }
 0x38d   : > { %v2189_v24 = vpop.f32.mrb[64].mxu0 }
 0x38e   : > { %v1410_v25 = vadd.f32 %v2189_v24, %v2704_v23  ;;  %v1401_v26 = vpop.f32.mrb[65].mxu0 }
 0x38f   : > { %v1402_v27 = vadd.f32 %v2704_v23, %v1401_v26  ;;  %v2190_v37 = vpop.f32.mrb[66].mxu0 }
 0x390   : > { %v1530_v29 = vmax.f32 %v1410_v25, 0.0  ;;  %v1413_v30 = vadd.f32 %v2190_v37, %v2704_v23  ;;  %v1404_v31 = vpop.f32.mrb[67].mxu0 }
 0x391   : > { %v1528_v32 = vmax.f32 %v1402_v27, 0.0  ;;  %v1405_v35 = vadd.f32 %v2704_v23, %v1404_v31 }
 0x392   : > { %v1569_v33 = vmul.f32 %v2711_v28, %v1530_v29  ;;  %v1531_v34 = vmax.f32 %v1413_v30, 0.0 }
 0x393   : > { %v1567_v38 = vmul.f32 %v2711_v28, %v1528_v32  ;;  %v1529_v63 = vmax.f32 %v1405_v35, 0.0 }
 0x394   : > { %v1606_v36 = vsel %vm1599_vm2, %v1569_v33, 0.0  ;;  %v1570_v45 = vmul.f32 %v2711_v28, %v1531_v34 }
 0x395   : > { %v2193_v39 = vpop.f32.mrb[32].mxu1  ;;  %1607 = vadd.xlane.f32.xlu0 %v1606_v36  ;;  %v1600_v44 = vsel %vm1599_vm2, %v1567_v38, 0.0  ;;  %v1568_v49 = vmul.f32 %v2711_v28, %v1529_v63 }
 0x396   : > { %v1417_v40 = vpop.f32.mrb[33].mxu1  ;;  %v1426_v42 = vadd.f32 %v2193_v39, %v2704_v23  ;;  %v1609_v48 = vsel %vm1599_vm2, %v1570_v45, 0.0 }
 0x397   : > { %v2194_v41 = vpop.f32.mrb[34].mxu1  ;;  %v1418_v47 = vadd.f32 %v2704_v23, %v1417_v40  ;;  %v1603_v56 = vsel %vm1599_vm2, %v1568_v49, 0.0 }
 0x398   : > { %v1420_v43 = vpop.f32.mrb[35].mxu1  ;;  %v1534_v46 = vmax.f32 %v1426_v42, 0.0  ;;  %v1429_v54 = vadd.f32 %v2194_v41, %v2704_v23 }
 0x399   : > { %1601 = vadd.xlane.f32.xlu0 %v1600_v44  ;;  %v1532_v53 = vmax.f32 %v1418_v47, 0.0  ;;  %v1421_v59 = vadd.f32 %v2704_v23, %v1420_v43 }
 0x39a   : > { %v1573_v57 = vmul.f32 %v2711_v28, %v1534_v46  ;;  %v1535_v58 = vmax.f32 %v1429_v54, 0.0 }
 0x39b   : > { %v1571_v61 = vmul.f32 %v2711_v28, %v1532_v53  ;;  %v1533_v2 = vmax.f32 %v1421_v59, 0.0 }
 0x39c   : > { %v1618_v60 = vsel %vm1599_vm2, %v1573_v57, 0.0  ;;  %v1574_v6 = vmul.f32 %v2711_v28, %v1535_v58 }
 0x39d   : > { %v2197_v50 = vpop.f32.mrb[36].mxu1  ;;  %1610 = vadd.xlane.f32.xlu0 %v1609_v48  ;;  %v1612_v5 = vsel %vm1599_vm2, %v1571_v61, 0.0  ;;  %v1572_v10 = vmul.f32 %v2711_v28, %v1533_v2 }
 0x39e   : > { %v1433_v51 = vpop.f32.mrb[37].mxu1  ;;  %v1442_v3 = vadd.f32 %v2197_v50, %v2704_v23  ;;  %v1621_v9 = vsel %vm1599_vm2, %v1574_v6, 0.0 }
 0x39f   : > { %v2198_v52 = vpop.f32.mrb[38].mxu1  ;;  %v1434_v7 = vadd.f32 %v2704_v23, %v1433_v51  ;;  %v1615_v21 = vsel %vm1599_vm2, %v1572_v10, 0.0 }
 0x3a0   : > { %v1436_v55 = vpop.f32.mrb[39].mxu1  ;;  %v1538_v8 = vmax.f32 %v1442_v3, 0.0  ;;  %v1445_v15 = vadd.f32 %v2198_v52, %v2704_v23 }
 0x3a1   : > { %1604 = vadd.xlane.f32.xlu0 %v1603_v56  ;;  %v1536_v14 = vmax.f32 %v1434_v7, 0.0  ;;  %v1437_v27 = vadd.f32 %v2704_v23, %v1436_v55 }
 0x3a2   : > { %v1577_v22 = vmul.f32 %v2711_v28, %v1538_v8  ;;  %v1539_v26 = vmax.f32 %v1445_v15, 0.0 }
 0x3a3   : > { %v1575_v29 = vmul.f32 %v2711_v28, %v1536_v14  ;;  %v1537_v38 = vmax.f32 %v1437_v27, 0.0 }
 0x3a4   : > { %v1630_v32 = vsel %vm1599_vm2, %v1577_v22, 0.0  ;;  %v1578_v41 = vmul.f32 %v2711_v28, %v1539_v26 }
 0x3a5   : > { %v2201_v62 = vpop.f32.mrb[40].mxu1  ;;  %1619 = vadd.xlane.f32.xlu0 %v1618_v60  ;;  %v1624_v44 = vsel %vm1599_vm2, %v1575_v29, 0.0  ;;  %v1576_v49 = vmul.f32 %v2711_v28, %v1537_v38 }
 0x3a6   : > { %v1449_v0 = vpop.f32.mrb[41].mxu1  ;;  %v1458_v35 = vadd.f32 %v2201_v62, %v2704_v23  ;;  %v1633_v53 = vsel %vm1599_vm2, %v1578_v41, 0.0 }
 0x3a7   : > { %v2202_v1 = vpop.f32.mrb[42].mxu1  ;;  %v1450_v47 = vadd.f32 %v2704_v23, %v1449_v0  ;;  %v1627_v2 = vsel %vm1599_vm2, %v1576_v49, 0.0 }
 0x3a8   : > { %v2731_v4 = vpop.f32.mrb[43].mxu1  ;;  %v1542_v46 = vmax.f32 %v1458_v35, 0.0  ;;  %v1461_v54 = vadd.f32 %v2202_v1, %v2704_v23 }
 0x3a9   : > { %1613 = vadd.xlane.f32.xlu0 %v1612_v5  ;;  %v1540_v56 = vmax.f32 %v1450_v47, 0.0 }
 0x3aa   : > { %v1581_v59 = vmul.f32 %v2711_v28, %v1542_v46  ;;  %v1543_v8 = vmax.f32 %v1461_v54, 0.0 }
 0x3ab   : > { %v1579_v14 = vmul.f32 %v2711_v28, %v1540_v56 }
 0x3ad   : > { %v2205_v11 = vpop.f32.mrb[44].mxu1  ;;  %1622 = vadd.xlane.f32.xlu0 %v1621_v9  ;;  %v1453_v9 = vadd.f32 %v2704_v23, %v2731_v4 }
 0x3ae   : > { %v1474_v12 = vadd.f32 %v2205_v11, %v2704_v23  ;;  %v1465_v13 = vpop.f32.mrb[45].mxu1 }
 0x3af   : > { %v1466_v16 = vadd.f32 %v2704_v23, %v1465_v13  ;;  %v2206_v17 = vpop.f32.mrb[46].mxu1  ;;  %v1642_v13 = vsel %vm1599_vm2, %v1581_v59, 0.0  ;;  %v1541_v27 = vmax.f32 %v1453_v9, 0.0 }
 0x3b0   : > { %v1546_v18 = vmax.f32 %v1474_v12, 0.0  ;;  %v1477_v19 = vadd.f32 %v2206_v17, %v2704_v23  ;;  %v1468_v20 = vpop.f32.mrb[47].mxu1 }
 0x3b1   : > { %v1544_v24 = vmax.f32 %v1466_v16, 0.0  ;;  %1616 = vadd.xlane.f32.xlu0 %v1615_v21  ;;  %v1469_v37 = vadd.f32 %v2704_v23, %v1468_v20 }
 0x3b2   : > { %v1585_v25 = vmul.f32 %v2711_v28, %v1546_v18  ;;  %v1547_v30 = vmax.f32 %v1477_v19, 0.0 }
 0x3b3   : > { %v1583_v33 = vmul.f32 %v2711_v28, %v1544_v24  ;;  %v1545_v39 = vmax.f32 %v1469_v37, 0.0  ;;  %v1582_v37 = vmul.f32 %v2711_v28, %v1543_v8 }
 0x3b4   : > { %v1654_v31 = vsel %vm1599_vm2, %v1585_v25, 0.0  ;;  %v1586_v45 = vmul.f32 %v2711_v28, %v1547_v30 }
 0x3b5   : > { %1655 = vadd.xlane.f32.xlu1 %v1654_v31  ;;  %v2209_v34 = vpop.f32.mrb[48].mxu1  ;;  %1631 = vadd.xlane.f32.xlu0 %v1630_v32  ;;  %v1648_v43 = vsel %vm1599_vm2, %v1583_v33, 0.0  ;;  %v1584_v48 = vmul.f32 %v2711_v28, %v1545_v39  ;;  %v1636_v33 = vsel %vm1599_vm2, %v1579_v14, 0.0  ;;  %v1645_v46 = vsel %vm1599_vm2, %v1582_v37, 0.0 }
 0x3b6   : > { %v1481_v36 = vpop.f32.mrb[49].mxu1  ;;  %v1490_v63 = vadd.f32 %v2209_v34, %v2704_v23  ;;  %v1657_v52 = vsel %vm1599_vm2, %v1586_v45, 0.0 }
 0x3b7   : > { %v2210_v40 = vpop.f32.mrb[50].mxu1  ;;  %v1482_v51 = vadd.f32 %v2704_v23, %v1481_v36  ;;  %v1651_v0 = vsel %vm1599_vm2, %v1584_v48, 0.0  ;;  %v1580_v48 = vmul.f32 %v2711_v28, %v1541_v27 }
 0x3b8   : > { %v1484_v42 = vpop.f32.mrb[51].mxu1  ;;  %v1550_v50 = vmax.f32 %v1490_v63, 0.0  ;;  %v1493_v60 = vadd.f32 %v2210_v40, %v2704_v23 }
 0x3b9   : > { %1649 = vadd.xlane.f32.xlu1 %v1648_v43  ;;  %1625 = vadd.xlane.f32.xlu0 %v1624_v44  ;;  %v1548_v3 = vmax.f32 %v1482_v51, 0.0  ;;  %v1485_v17 = vadd.f32 %v2704_v23, %v1484_v42 }
 0x3ba   : > { %v1589_v7 = vmul.f32 %v2711_v28, %v1550_v50  ;;  %v1551_v16 = vmax.f32 %v1493_v60, 0.0 }
 0x3bb   : > { %v1587_v20 = vmul.f32 %v2711_v28, %v1548_v3  ;;  %v1549_v32 = vmax.f32 %v1485_v17, 0.0 }
 0x3bc   : > { %v1666_v4 = vsel %vm1599_vm2, %v1589_v7, 0.0  ;;  %v1590_v39 = vmul.f32 %v2711_v28, %v1551_v16 }
 0x3bd   : > { %1658 = vadd.xlane.f32.xlu1 %v1657_v52  ;;  %1634 = vadd.xlane.f32.xlu0 %v1633_v53  ;;  %v2213_v55 = vpop.f32.mrb[52].mxu1  ;;  %v1660_v38 = vsel %vm1599_vm2, %v1587_v20, 0.0  ;;  %v1588_v51 = vmul.f32 %v2711_v28, %v1549_v32 }
 0x3be   : > { %v1506_v57 = vadd.f32 %v2213_v55, %v2704_v23  ;;  %v1497_v58 = vpop.f32.mrb[53].mxu1  ;;  %v1669_v50 = vsel %vm1599_vm2, %v1590_v39, 0.0 }
 0x3bf   : > { %v1498_v61 = vadd.f32 %v2704_v23, %v1497_v58  ;;  %v2214_v62 = vpop.f32.mrb[54].mxu1  ;;  %v1639_v58 = vsel %vm1599_vm2, %v1580_v48, 0.0 }
 0x3c0   : > { %v1554_v1 = vmax.f32 %v1506_v57, 0.0  ;;  %v1509_v5 = vadd.f32 %v2214_v62, %v2704_v23  ;;  %v1500_v6 = vpop.f32.mrb[55].mxu1  ;;  %v1663_v57 = vsel %vm1599_vm2, %v1588_v51, 0.0 }
 0x3c1   : > { %v1552_v10 = vmax.f32 %v1498_v61, 0.0  ;;  %v1501_v11 = vadd.f32 %v2704_v23, %v1500_v6  ;;  %1652 = vadd.xlane.f32.xlu1 %v1651_v0  ;;  %1628 = vadd.xlane.f32.xlu0 %v1627_v2 }
 0x3c2   : > { %v1555_v12 = vmax.f32 %v1509_v5, 0.0  ;;  %v1593_v15 = vmul.f32 %v2711_v28, %v1554_v1 }
 0x3c3   : > { %v1553_v18 = vmax.f32 %v1501_v11, 0.0  ;;  %v1591_v19 = vmul.f32 %v2711_v28, %v1552_v10 }
 0x3c4   : > { %v1678_v21 = vsel %vm1599_vm2, %v1593_v15, 0.0  ;;  %v1594_v22 = vmul.f32 %v2711_v28, %v1555_v12 }
 0x3c5   : > { %1667 = vadd.xlane.f32.xlu1 %v1666_v4  ;;  %1643 = vadd.xlane.f32.xlu0 %v1642_v13  ;;  %v2217_v24 = vpop.f32.mrb[56].mxu1  ;;  %v1672_v25 = vsel %vm1599_vm2, %v1591_v19, 0.0  ;;  %v1592_v26 = vmul.f32 %v2711_v28, %v1553_v18 }
 0x3c6   : > { %v1522_v29 = vadd.f32 %v2217_v24, %v2704_v23  ;;  %v1513_v30 = vpop.f32.mrb[57].mxu1  ;;  %v1681_v31 = vsel %vm1599_vm2, %v1594_v22, 0.0 }
 0x3c7   : > { %v1514_v34 = vadd.f32 %v2704_v23, %v1513_v30  ;;  %v2218_v35 = vpop.f32.mrb[58].mxu1  ;;  %v1675_v36 = vsel %vm1599_vm2, %v1592_v26, 0.0 }
 0x3c8   : > { %v1558_v40 = vmax.f32 %v1522_v29, 0.0  ;;  %v1525_v41 = vadd.f32 %v2218_v35, %v2704_v23  ;;  %v1516_v63 = vpop.f32.mrb[59].mxu1 }
 0x3c9   : > { %1661 = vadd.xlane.f32.xlu1 %v1660_v38  ;;  %1637 = vadd.xlane.f32.xlu0 %v1636_v33  ;;  %v1556_v42 = vmax.f32 %v1514_v34, 0.0  ;;  %v1517_v43 = vadd.f32 %v2704_v23, %v1516_v63 }
 0x3ca   : > { %v1559_v44 = vmax.f32 %v1525_v41, 0.0  ;;  %v1597_v45 = vmul.f32 %v2711_v28, %v1558_v40 }
 0x3cb   : > { %v1557_v47 = vmax.f32 %v1517_v43, 0.0  ;;  %v1595_v49 = vmul.f32 %v2711_v28, %v1556_v42 }
 0x3cc   : > { %v1690_v52 = vsel %vm1599_vm2, %v1597_v45, 0.0  ;;  %v1598_v53 = vmul.f32 %v2711_v28, %v1559_v44 }
 0x3cd   : > { %1670 = vadd.xlane.f32.xlu1 %v1669_v50  ;;  %1646 = vadd.xlane.f32.xlu0 %v1645_v46  ;;  %v1684_v23 = vsel %vm1599_vm2, %v1595_v49, 0.0  ;;  %v1596_v54 = vmul.f32 %v2711_v28, %v1557_v47  ;;  %v2810_v28 = vld [vmem:[#allocation2] ss:$0 sm:$0xff] }
 0x3ce   : > { %v1693_v55 = vsel %vm1599_vm2, %v1598_v53, 0.0 }
 0x3cf   : > { %v1687_v56 = vsel %vm1599_vm2, %v1596_v54, 0.0 }
 0x3d1   : > { %1664 = vadd.xlane.f32.xlu1 %v1663_v57  ;;  %1640 = vadd.xlane.f32.xlu0 %v1639_v58 }
 0x3d5   : > { %1679 = vadd.xlane.f32.xlu1 %v1678_v21 }
 0x3d9   : > { %1673 = vadd.xlane.f32.xlu1 %v1672_v25 }
 0x3dd   : > { %1682 = vadd.xlane.f32.xlu1 %v1681_v31 }
 0x3e1   : > { %1676 = vadd.xlane.f32.xlu1 %v1675_v36 }
 0x3e5   : > { %1691 = vadd.xlane.f32.xlu1 %v1690_v52 }
 0x3e9   : > { %1685 = vadd.xlane.f32.xlu1 %v1684_v23 }
 0x3ed   : > { %1694 = vadd.xlane.f32.xlu1 %v1693_v55 }
 0x3f1   : > { %1688 = vadd.xlane.f32.xlu1 %v1687_v56 }
 0x422   : > { %v1608_v59 = vpop.xlane.xlu0 %1607 }
 0x423   : > { %v1705_v1 = vadd.f32 %v2810_v28, %v1608_v59 }
 0x426   : > { %v1602_v60 = vpop.xlane.xlu0 %1601 }
 0x427   : > { %v1703_v61 = vadd.f32 %v2810_v28, %v1602_v60  ;;  %v2343_v60 = vmov 1966171168  }
 0x429   : > { %1735 = vxpose.xlu0.b32.start [1/16] (narrow) %v1703_v61, 8  ;;  %v1803_v61 = vunpack.c.l.s4 %v2343_v60 }
 0x42a   : > { %v1611_v62 = vpop.xlane.xlu0 %1610 }
 0x42b   : > { %v1706_v6 = vadd.f32 %v2810_v28, %v1611_v62  ;;  %v1805_v62 = vlaneseq }
 0x42d   : > { %vm1819_vm3 = vcmp.lt.s32.totalorder %v1805_v62, 256 }
 0x42e   : > { %v1605_v0 = vpop.xlane.xlu0 %1604 }
 0x42f   : > { %v1704_v2 = vadd.f32 %v2810_v28, %v1605_v0  ;;  %v1804_v0 = vunpack.c.0.s8 %v1803_v61 }
 0x431   : > { %1736 = vxpose.xlu0.b32.cont [2/16] (narrow) %v1704_v2, 8  ;;  %v1806_v2 = vshrl.u32 %v1805_v62, 7 }
 0x432   : > { %v1620_v3 = vpop.xlane.xlu0 %1619 }
 0x433   : > { %v1709_v13 = vadd.f32 %v2810_v28, %v1620_v3 }
 0x435   : > { %1737 = vxpose.xlu0.b32.cont [3/16] (narrow) %v1705_v1, 8  ;;  %v1807_v1 = vsub.s32 %v1804_v0, %v1806_v2 }
 0x436   : > { %v1614_v5 = vpop.xlane.xlu0 %1613 }
 0x437   : > { %v1707_v8 = vadd.f32 %v2810_v28, %v1614_v5 }
 0x439   : > { %1738 = vxpose.xlu0.b32.cont [4/16] (narrow) %v1706_v6, 8 }
 0x43a   : > { %v1623_v7 = vpop.xlane.xlu0 %1622 }
 0x43b   : > { %v1710_v16 = vadd.f32 %v2810_v28, %v1623_v7 }
 0x43d   : > { %1739 = vxpose.xlu0.b32.cont [5/16] (narrow) %v1707_v8, 8 }
 0x43e   : > { %v1617_v9 = vpop.xlane.xlu0 %1616 }
 0x43f   : > { %v1708_v10 = vadd.f32 %v2810_v28, %v1617_v9 }
 0x441   : > { %1740 = vxpose.xlu0.b32.cont [6/16] (narrow) %v1708_v10, 8 }
 0x442   : > { %v1656_v11 = vpop.xlane.xlu1 %1655  ;;  %v1632_v12 = vpop.xlane.xlu0 %1631 }
 0x443   : > { %v1721_v27 = vadd.f32 %v2810_v28, %v1656_v11  ;;  %v1713_v37 = vadd.f32 %v2810_v28, %v1632_v12 }
 0x445   : > { %1741 = vxpose.xlu0.b32.cont [7/16] (narrow) %v1709_v13, 8 }
 0x446   : > { %v1650_v14 = vpop.xlane.xlu1 %1649  ;;  %v1626_v15 = vpop.xlane.xlu0 %1625 }
 0x447   : > { %v1719_v17 = vadd.f32 %v2810_v28, %v1650_v14  ;;  %v1711_v4 = vadd.f32 %v2810_v28, %v1626_v15 }
 0x449   : > { %1767 = vxpose.xlu1.b32.start [1/16] (narrow) %v1719_v17, 8  ;;  %1742 = vxpose.xlu0.b32.cont [8/16] (narrow) %v1710_v16, 8 }
 0x44a   : > { %v1659_v18 = vpop.xlane.xlu1 %1658  ;;  %v1635_v19 = vpop.xlane.xlu0 %1634 }
 0x44b   : > { %v1722_v31 = vadd.f32 %v2810_v28, %v1659_v18  ;;  %v1714_v32 = vadd.f32 %v2810_v28, %v1635_v19 }
 0x44d   : > { %1743 = vxpose.xlu0.b32.cont [9/16] (narrow) %v1711_v4, 8 }
 0x44e   : > { %v1653_v20 = vpop.xlane.xlu1 %1652  ;;  %v1629_v21 = vpop.xlane.xlu0 %1628 }
 0x44f   : > { %v1720_v22 = vadd.f32 %v2810_v28, %v1653_v20  ;;  %v1712_v24 = vadd.f32 %v2810_v28, %v1629_v21 }
 0x451   : > { %1768 = vxpose.xlu1.b32.cont [2/16] (narrow) %v1720_v22, 8  ;;  %1744 = vxpose.xlu0.b32.cont [10/16] (narrow) %v1712_v24, 8 }
 0x452   : > { %v1668_v25 = vpop.xlane.xlu1 %1667  ;;  %v1644_v26 = vpop.xlane.xlu0 %1643 }
 0x453   : > { %v1725_v42 = vadd.f32 %v2810_v28, %v1668_v25  ;;  %v1717_v43 = vadd.f32 %v2810_v28, %v1644_v26 }
 0x455   : > { %1769 = vxpose.xlu1.b32.cont [3/16] (narrow) %v1721_v27, 8  ;;  %1745 = vxpose.xlu0.b32.cont [11/16] (narrow) %v1713_v37, 8 }
 0x456   : > { %v1662_v29 = vpop.xlane.xlu1 %1661  ;;  %v1638_v30 = vpop.xlane.xlu0 %1637 }
 0x457   : > { %v1723_v35 = vadd.f32 %v2810_v28, %v1662_v29  ;;  %v1715_v36 = vadd.f32 %v2810_v28, %v1638_v30 }
 0x459   : > { %1770 = vxpose.xlu1.b32.cont [4/16] (narrow) %v1722_v31, 8  ;;  %1746 = vxpose.xlu0.b32.cont [12/16] (narrow) %v1714_v32, 8 }
 0x45a   : > { %v1671_v33 = vpop.xlane.xlu1 %1670  ;;  %v1647_v34 = vpop.xlane.xlu0 %1646 }
 0x45b   : > { %v1726_v45 = vadd.f32 %v2810_v28, %v1671_v33  ;;  %v1718_v46 = vadd.f32 %v2810_v28, %v1647_v34 }
 0x45d   : > { %1771 = vxpose.xlu1.b32.cont [5/16] (narrow) %v1723_v35, 8  ;;  %1747 = vxpose.xlu0.b32.cont [13/16] (narrow) %v1715_v36, 8 }
 0x45e   : > { %v1665_v38 = vpop.xlane.xlu1 %1664  ;;  %v1641_v39 = vpop.xlane.xlu0 %1640 }
 0x45f   : > { %v1724_v40 = vadd.f32 %v2810_v28, %v1665_v38  ;;  %v1716_v41 = vadd.f32 %v2810_v28, %v1641_v39 }
 0x461   : > { %1772 = vxpose.xlu1.b32.cont [6/16] (narrow) %v1724_v40, 8  ;;  %1748 = vxpose.xlu0.b32.cont [14/16] (narrow) %v1716_v41, 8 }
 0x462   : > { %v1680_v63 = vpop.xlane.xlu1 %1679 }
 0x463   : > { %v1729_v52 = vadd.f32 %v2810_v28, %v1680_v63 }
 0x465   : > { %1773 = vxpose.xlu1.b32.cont [7/16] (narrow) %v1725_v42, 8  ;;  %1749 = vxpose.xlu0.b32.cont [15/16] (narrow) %v1717_v43, 8 }
 0x466   : > { %v1674_v44 = vpop.xlane.xlu1 %1673 }
 0x467   : > { %v1727_v48 = vadd.f32 %v2810_v28, %v1674_v44 }
 0x469   : > { %1774 = vxpose.xlu1.b32.cont [8/16] (narrow) %v1726_v45, 8  ;;  %1750 = vxpose.xlu0.b32.end [16/16] (narrow) %v1718_v46, 8 }
 0x46a   : > { %v1683_v47 = vpop.xlane.xlu1 %1682 }
 0x46b   : > { %v1730_v23 = vadd.f32 %v2810_v28, %v1683_v47 }
 0x46d   : > { %1775 = vxpose.xlu1.b32.cont [9/16] (narrow) %v1727_v48, 8 }
 0x46e   : > { %v1677_v49 = vpop.xlane.xlu1 %1676 }
 0x46f   : > { %v1728_v50 = vadd.f32 %v2810_v28, %v1677_v49 }
 0x471   : > { %1776 = vxpose.xlu1.b32.cont [10/16] (narrow) %v1728_v50, 8 }
 0x472   : > { %v1692_v51 = vpop.xlane.xlu1 %1691 }
 0x473   : > { %v1733_v58 = vadd.f32 %v2810_v28, %v1692_v51 }
 0x475   : > { %1777 = vxpose.xlu1.b32.cont [11/16] (narrow) %v1729_v52, 8 }
 0x476   : > { %v1686_v53 = vpop.xlane.xlu1 %1685 }
 0x477   : > { %v1731_v55 = vadd.f32 %v2810_v28, %v1686_v53 }
 0x479   : > { %1778 = vxpose.xlu1.b32.cont [12/16] (narrow) %v1730_v23, 8 }
 0x47a   : > { %v1695_v54 = vpop.xlane.xlu1 %1694 }
 0x47b   : > { %v1734_v59 = vadd.f32 %v2810_v28, %v1695_v54 }
 0x47d   : > { %1779 = vxpose.xlu1.b32.cont [13/16] (narrow) %v1731_v55, 8 }
 0x47e   : > { %v1689_v56 = vpop.xlane.xlu1 %1688 }
 0x47f   : > { %v1732_v57 = vadd.f32 %v2810_v28, %v1689_v56 }
 0x481   : > { %1780 = vxpose.xlu1.b32.cont [14/16] (narrow) %v1732_v57, 8 }
 0x485   : > { %1781 = vxpose.xlu1.b32.cont [15/16] (narrow) %v1733_v58, 8 }
 0x489   : > { %1782 = vxpose.xlu1.b32.end [16/16] (narrow) %v1734_v59, 8 }
 0x4ad   : > { %v1751_v3 = vpop.trf.xlu0 }
 0x4cd   : > { %v1783_v5 = vpop.trf.xlu1 }
 0x4ce   : > { %v1801_v6 = vcombine.low %v1751_v3, %v1783_v5 }
 0x4d0   : > { %v1808_v7 = vrot.slane %v1801_v6, %v1807_v1 }
 0x4d2   : > { %v1815_v8 = vrot.slane %v1808_v7, %v1807_v1 }
 0x4d4   : > { %1821 = vst.msk [vmem:[%s382_s12] sm:$0x3] %vm1819_vm3, %v1815_v8 }
 0x4d5   : > { %2292 = shalt.err (!%p2289_p3)
}
 0x4d6   : > { %s2293_s13 = scalar_lea.hbm %s2849_s10, 32  ;;  %s2297_s23 = scalar_lea.hbm %s2902_s11, 64 }
 0x4d7   : > { %p2294_p4 = scmp.ne.s32.totalorder %s2849_s10, %s2293_s13  ;;  %p2298_p9 = scmp.lt.u32.totalorder %s2849_s10, %s2902_s11 }
 0x4d8   : > { %p2299_p10 = scmp.lt.u32.totalorder %s2297_s23, %s2293_s13  ;;  %p2301_p12 = scmp.lt.u32.totalorder %s2293_s13, %s2849_s10 }
 0x4d9   : > { %p2295_p7 = pnand %p2294_p4, %p2443_p5 }
 0x4da   : > { %p2300_p11 = por %p2299_p10, %p2298_p9 }
 0x4db   : > { %p2296_p8 = pneg %p2295_p7 }
 0x4dc   : > { %p2302_p13 = por %p2301_p12, %p2300_p11 }
 0x4de   : > { %p2303_p0 = pnand %p2302_p13, %p2296_p8 }
 0x4e0   : > { %2306 = shalt.err (!%p2303_p0)
}
 0x4e1   : > { %2223 = dma.vmem_to_hbm [thread:$0]  (%p2443_p5), %s2851_s18, 32, %s2849_s10, %s1823_s26  }
 0x4e2 PF: > { %p2229_p1 = scmp.ge.s32.totalorder %s2341_s22, 2  ;;  %s1849_s30 = sand.u32 1, %s2329_s19  }
 0x4e3   : > { %s1850_s15 = scalar_lea.sflag [#allocation4], %s1849_s30 }
 0x4e4   : > { %p2226_p2 = pnand %p2229_p1, %p2447_p6 }
 0x4e6   : > { %2324 = dma.done.wait (!%p2226_p2), %s1850_s15, 32  }
 0x4e7   : > { %2326 = vsyncadd (!%p2226_p2), %s1850_s15, 4294967264  ;;  %p23_p3 = scmp.ge.s32.totalorder %s2431_s24, 4   ;;  %s2905_s19 = smov %s2333_s20 }
 0x4e8   : > { %s2906_s20 = smov %s2337_s21  ;;  %s2907_s21 = smov %s2441_s27 }
 0x4e9   : > { %s2908_s22 = smov %s2431_s24  ;;  %25 = sbr.rel (!%p23_p3) target bundleno = 6 (0x6), region = 99 }
 0x4f0   :  { %1855 = vsyncpa [#allocation4], 1 }
 0x4f1   :  { %1857 = vsyncpa [#allocation4 + $0x1], 1 }

</bundles_post_ra>
